<compile_context>
chip_gen: v7x
topology: tpu7x:2x2x1
jax: 0.10.0
libtpu: 0.0.40
codegen_flags: <defaults>
</compile_context>

<pallas_src>
import functools

import jax
import jax.numpy as jnp
from jax.experimental import pallas as pl
from jax.experimental.pallas import tpu as pltpu

TRAJ_DIM = 2          # [xpos, ypos]
HIDDEN_DIM = 512      # PyTorch module default
NUM_LAYERS = 5        # 4 hidden Linear+act layers + 1 output Linear
D_OUT_PAD = 128       # lane-dense padded output width


def _cdiv(a, b):
    return -(-a // b)


def _round_up(a, b):
    return _cdiv(a, b) * b


def _tpu_generation():
    """Best-effort TPU generation from device_kind; 0 if unknown."""
    try:
        kind = jax.devices()[0].device_kind.lower()
    except Exception:  # pragma: no cover
        return 0
    for g in (7, 6, 5, 4, 3, 2):
        if (f"v{g}" in kind) or (f"tpu{g}" in kind):
            return g
    return 0


def _hw_config():
    """Generation-aware tiling / activation / VMEM policy."""
    gen = _tpu_generation()
    if gen >= 7:      # v7x: 2 TCs, 64 MiB physical / 32 MiB default scoped VMEM
        return dict(max_tile_b=2048, min_grid_steps=2, fast_act=True,
                    vmem_limit=48 << 20)
    if gen == 6:      # v6e: 1 TC, 128 MiB physical / 32 MiB default scoped
        return dict(max_tile_b=2048, min_grid_steps=1, fast_act=True,
                    vmem_limit=64 << 20)
    if gen == 5:      # v5e/v5p: 1 TC, MXU-bound here; no bf16 VPU/EUP on v5e
        return dict(max_tile_b=1024, min_grid_steps=1, fast_act=False,
                    vmem_limit=32 << 20)
    # unknown generation: conservative defaults
    return dict(max_tile_b=1024, min_grid_steps=1, fast_act=False,
                vmem_limit=32 << 20)


def _pick_tile_b(batch, max_tile, min_steps):
    """Sublane-aligned batch tile; force >= min_steps grid steps if possible."""
    b8 = _round_up(max(batch, 1), 8)
    if b8 < 8 * min_steps:
        min_steps = 1
    n_steps = max(min_steps, _cdiv(b8, max_tile))
    return _round_up(_cdiv(b8, n_steps), 8)


# ----------------------------------------------------------------------------
# Kernel
# ----------------------------------------------------------------------------
def _mlp_kernel(fast_act,
                x_ref,
                w0_ref, b0_ref,
                w1_ref, b1_ref,
                w2_ref, b2_ref,
                w3_ref, b3_ref,
                w4_ref, b4_ref,
                o_ref):
    """Whole 5-layer MLP for one batch tile, all weights resident in VMEM."""
    mxu = w0_ref.dtype                       # bf16 (or f32) MXU operand dtype
    f32 = jnp.float32

    def silu(h):                             # h: f32 (acc + bias)
        if fast_act:
            # sigmoid via EUP exp + approx EUP reciprocal (no exact divide).
            s = pl.reciprocal(1.0 + jnp.exp(-h), approx=True)
        else:
            s = jax.nn.sigmoid(h)            # exact f32 path (v5e: MXU-bound)
        return (h * s).astype(mxu)

    def relu(h):
        return jnp.maximum(h, 0.0).astype(mxu)

    x = x_ref[...].astype(mxu)

    # layer 0: Linear(traj_dim+1 -> hidden) + SiLU      (i % 2 == 0)
    h = silu(jnp.dot(x, w0_ref[...], preferred_element_type=f32) + b0_ref[...])
    # layer 1: Linear(hidden -> hidden) + ReLU          (i % 2 == 1)
    h = relu(jnp.dot(h, w1_ref[...], preferred_element_type=f32) + b1_ref[...])
    # layer 2: Linear(hidden -> hidden) + SiLU
    h = silu(jnp.dot(h, w2_ref[...], preferred_element_type=f32) + b2_ref[...])
    # layer 3: Linear(hidden -> hidden) + ReLU
    h = relu(jnp.dot(h, w3_ref[...], preferred_element_type=f32) + b3_ref[...])
    # output layer: Linear(hidden -> traj_dim, lane-padded to 128), no act
    o_ref[...] = (jnp.dot(h, w4_ref[...], preferred_element_type=f32)
                  + b4_ref[...]).astype(o_ref.dtype)


# ----------------------------------------------------------------------------
# One-time parameter preparation (hoisted out of the per-call path)
# ----------------------------------------------------------------------------
def prepare_params(params, *, mxu_dtype=jnp.bfloat16):
    """Pad + cast weights once. Returns a flat tuple of kernel-ready arrays.

    Weights -> mxu_dtype (bf16 by default, f32 accumulation in-kernel),
    biases -> f32. w0 rows padded to 8 lanes-of-sublane, w4/b4 output lanes
    padded to 128 so the kernel output is lane-dense.
    """
    (w0, b0), (w1, b1), (w2, b2), (w3, b3), (w4, b4) = params
    d_in, hidden = w0.shape
    d_out = w4.shape[1]
    assert hidden % 128 == 0, "hidden width must be a multiple of 128 lanes"

    d_in_pad = _round_up(d_in, 8)
    w0_p = (jnp.zeros((d_in_pad, hidden), mxu_dtype)
            .at[:d_in, :].set(w0.astype(mxu_dtype)))
    w4_p = (jnp.zeros((hidden, D_OUT_PAD), mxu_dtype)
            .at[:, :d_out].set(w4.astype(mxu_dtype)))
    b4_p = (jnp.zeros((1, D_OUT_PAD), jnp.float32)
            .at[:, :d_out].set(b4.astype(jnp.float32)))

    return (w0_p, b0.astype(jnp.float32),
            w1.astype(mxu_dtype), b1.astype(jnp.float32),
            w2.astype(mxu_dtype), b2.astype(jnp.float32),
            w3.astype(mxu_dtype), b3.astype(jnp.float32),
            w4_p, b4_p)


# ----------------------------------------------------------------------------
# Forward
# ----------------------------------------------------------------------------
@functools.partial(
    jax.jit,
    static_argnames=("tile_b", "d_out", "fast_act", "vmem_limit",
                     "return_padded"))
def _forward_impl(xt, prepared, *, tile_b, d_out, fast_act, vmem_limit,
                  return_padded):
    w0, b0, w1, b1, w2, b2, w3, b3, w4, b4 = prepared
    B, d_in = xt.shape
    d_in_pad = w0.shape[0]
    B_pad = _round_up(B, tile_b)

    # Only the (small) input slab is padded per-call; weights are pre-padded.
    xt_p = jnp.zeros((B_pad, d_in_pad), xt.dtype).at[:B, :d_in].set(xt)

    def full_spec(shape):
        # whole-array block, identical for every grid step (stays resident)
        return pl.BlockSpec(shape, lambda i: (0,) * len(shape))

    grid = (B_pad // tile_b,)
    in_specs = [pl.BlockSpec((tile_b, d_in_pad), lambda i: (i, 0))]
    for arr in (w0, b0, w1, b1, w2, b2, w3, b3, w4, b4):
        in_specs.append(full_spec(arr.shape))

    out = pl.pallas_call(
        functools.partial(_mlp_kernel, fast_act),
        out_shape=jax.ShapeDtypeStruct((B_pad, D_OUT_PAD), jnp.float32),
        grid_spec=pltpu.PrefetchScalarGridSpec(
            num_scalar_prefetch=0,
            grid=grid,
            in_specs=in_specs,
            out_specs=pl.BlockSpec((tile_b, D_OUT_PAD), lambda i: (i, 0)),
        ),
        compiler_params=pltpu.CompilerParams(
            dimension_semantics=("parallel",),
            vmem_limit_bytes=vmem_limit),
    )(xt_p, w0, b0, w1, b1, w2, b2, w3, b3, w4, b4)

    if return_padded:
        return out                  # (B_pad, 128) lane-dense slab, no HBM re-pass
    return out[:B, :d_out]


def trajectory_flow_forward(xt, prepared, *, d_out=TRAJ_DIM, tile_b=None,
                            return_padded=False):
    """xt: (B, traj_dim + 1) f32 -> velocity (B, traj_dim) f32."""
    cfg = _hw_config()
    if tile_b is None:
        tile_b = _pick_tile_b(xt.shape[0], cfg["max_tile_b"],
                              cfg["min_grid_steps"])
    return _forward_impl(xt, prepared, tile_b=tile_b, d_out=d_out,
                         fast_act=cfg["fast_act"],
                         vmem_limit=cfg["vmem_limit"],
                         return_padded=return_padded)


# ----------------------------------------------------------------------------
# Init + reference (for the self-check)
# ----------------------------------------------------------------------------
def init_params(key, traj_dim=TRAJ_DIM, hidden_dim=HIDDEN_DIM,
                num_layers=NUM_LAYERS):
    """PyTorch-style (uniform +/- 1/sqrt(fan_in)) Linear init.

    Weights returned pre-transposed as (in_dim, out_dim)."""
    dims = []
    d_in = traj_dim + 1
    for _ in range(num_layers - 1):
        dims.append((d_in, hidden_dim))
        d_in = hidden_dim
    dims.append((hidden_dim, traj_dim))

    params = []
    for fan_in, fan_out in dims:
        key, kw, kb = jax.random.split(key, 3)
        bound = 1.0 / jnp.sqrt(float(fan_in))
        w = jax.random.uniform(kw, (fan_in, fan_out), jnp.float32,
                               minval=-bound, maxval=bound)
        b = jax.random.uniform(kb, (1, fan_out), jnp.float32,
                               minval=-bound, maxval=bound)
        params.append((w, b))
    return tuple(params)


def reference_forward(xt, params, mxu_dtype=None):
    """Plain-JAX reference of the same MLP (optionally mirroring bf16 MXU)."""
    def dot(a, w):
        if mxu_dtype is not None:
            a = a.astype(mxu_dtype)
            w = w.astype(mxu_dtype)
        return jnp.dot(a, w, preferred_element_type=jnp.float32)

    (w0, b0), (w1, b1), (w2, b2), (w3, b3), (w4, b4) = params
    h = jax.nn.silu(dot(xt, w0) + b0)
    h = jax.nn.relu(dot(h, w1) + b1)
    h = jax.nn.silu(dot(h, w2) + b2)
    h = jax.nn.relu(dot(h, w3) + b3)
    return dot(h, w4) + b4


if __name__ == "__main__":
    key = jax.random.PRNGKey(0)
    k_params, k_x = jax.random.split(key)

    params = init_params(k_params)
    prepared = prepare_params(params)   # one-time pad + bf16 cast, off hot path

    batch = 16
    # xt = [x, y, t]  (traj_dim positions concatenated with flow time)
    xt = jax.random.normal(k_x, (batch, TRAJ_DIM + 1), jnp.float32)

    velocity = trajectory_flow_forward(xt, prepared)
    velocity = jax.block_until_ready(velocity)
    assert velocity.shape == (batch, TRAJ_DIM)

    # Check vs. a reference mirroring the bf16-MXU / f32-accumulate path
    # (tolerance widened to accommodate the approx-reciprocal SiLU on
    # v6e/v7x), plus a loose check vs. pure-f32 module semantics.
    ref_mirror = reference_forward(xt, params, mxu_dtype=jnp.bfloat16)
    ref_f32 = reference_forward(xt, params)
    assert jnp.allclose(velocity, ref_mirror, atol=1e-2, rtol=1e-2)
    assert jnp.allclose(velocity, ref_f32, atol=5e-2, rtol=5e-2)

    print("KERNEL_OK")
</pallas_src>

<mosaic_0001>
module attributes {stable_mosaic.version = 11 : i64} {
  func.func @_mlp_kernel(%arg0: i32, %arg1: memref<16x8xf32, #tpu.memory_space<vmem>>, %arg2: memref<8x512xbf16, #tpu.memory_space<vmem>>, %arg3: memref<1x512xf32, #tpu.memory_space<vmem>>, %arg4: memref<512x512xbf16, #tpu.memory_space<vmem>>, %arg5: memref<1x512xf32, #tpu.memory_space<vmem>>, %arg6: memref<512x512xbf16, #tpu.memory_space<vmem>>, %arg7: memref<1x512xf32, #tpu.memory_space<vmem>>, %arg8: memref<512x512xbf16, #tpu.memory_space<vmem>>, %arg9: memref<1x512xf32, #tpu.memory_space<vmem>>, %arg10: memref<512x128xbf16, #tpu.memory_space<vmem>>, %arg11: memref<1x128xf32, #tpu.memory_space<vmem>>, %arg12: memref<16x128xf32, #tpu.memory_space<vmem>>) attributes {dimension_semantics = [#tpu.dimension_semantics<parallel>], iteration_bounds = array<i64: 1>, scalar_prefetch = 0 : i64, scratch_operands = 0 : i64, tpu.core_type = #tpu.core_type<tc>, window_params = [{transform_indices = @transform_0, window_bounds = array<i64: 16, 8>}, {pipeline_mode = #tpu.pipeline_mode<synchronous>, transform_indices = @transform_1, window_bounds = array<i64: 8, 512>}, {pipeline_mode = #tpu.pipeline_mode<synchronous>, transform_indices = @transform_2, window_bounds = array<i64: 1, 512>}, {pipeline_mode = #tpu.pipeline_mode<synchronous>, transform_indices = @transform_3, window_bounds = array<i64: 512, 512>}, {pipeline_mode = #tpu.pipeline_mode<synchronous>, transform_indices = @transform_4, window_bounds = array<i64: 1, 512>}, {pipeline_mode = #tpu.pipeline_mode<synchronous>, transform_indices = @transform_5, window_bounds = array<i64: 512, 512>}, {pipeline_mode = #tpu.pipeline_mode<synchronous>, transform_indices = @transform_6, window_bounds = array<i64: 1, 512>}, {pipeline_mode = #tpu.pipeline_mode<synchronous>, transform_indices = @transform_7, window_bounds = array<i64: 512, 512>}, {pipeline_mode = #tpu.pipeline_mode<synchronous>, transform_indices = @transform_8, window_bounds = array<i64: 1, 512>}, {pipeline_mode = #tpu.pipeline_mode<synchronous>, transform_indices = @transform_9, window_bounds = array<i64: 512, 128>}, {pipeline_mode = #tpu.pipeline_mode<synchronous>, transform_indices = @transform_10, window_bounds = array<i64: 1, 128>}, {transform_indices = @transform_11, window_bounds = array<i64: 16, 128>}]} {
    %c0 = arith.constant 0 : index
    %c0_0 = arith.constant 0 : index
    %0 = vector.load %arg1[%c0, %c0_0] : memref<16x8xf32, #tpu.memory_space<vmem>>, vector<16x8xf32>
    %1 = arith.truncf %0 : vector<16x8xf32> to vector<16x8xbf16>
    %c0_1 = arith.constant 0 : index
    %c0_2 = arith.constant 0 : index
    %2 = vector.load %arg2[%c0_1, %c0_2] : memref<8x512xbf16, #tpu.memory_space<vmem>>, vector<8x512xbf16>
    %cst = arith.constant dense<0.000000e+00> : vector<16x512xf32>
    %3 = tpu.matmul %1, %2, %cst {dimension_numbers = #tpu.dot_dimension_numbers<[1], [0], [0], [1], [0, 0, 1, 1], [], []>} : vector<16x8xbf16>, vector<8x512xbf16>, vector<16x512xf32> -> vector<16x512xf32>
    %c0_3 = arith.constant 0 : index
    %c0_4 = arith.constant 0 : index
    %4 = vector.load %arg3[%c0_3, %c0_4] : memref<1x512xf32, #tpu.memory_space<vmem>>, vector<1x512xf32>
    %5 = vector.broadcast %4 : vector<1x512xf32> to vector<16x512xf32>
    %6 = arith.addf %3, %5 : vector<16x512xf32>
    %7 = arith.negf %6 : vector<16x512xf32>
    %8 = math.exp %7 : vector<16x512xf32>
    %cst_5 = arith.constant 1.000000e+00 : f32
    %9 = vector.broadcast %cst_5 : f32 to vector<16x512xf32>
    %10 = arith.addf %9, %8 : vector<16x512xf32>
    %11 = arith.divf %9, %10 : vector<16x512xf32>
    %12 = arith.mulf %6, %11 : vector<16x512xf32>
    %13 = arith.truncf %12 : vector<16x512xf32> to vector<16x512xbf16>
    %c0_6 = arith.constant 0 : index
    %c0_7 = arith.constant 0 : index
    %14 = vector.load %arg4[%c0_6, %c0_7] : memref<512x512xbf16, #tpu.memory_space<vmem>>, vector<512x512xbf16>
    %cst_8 = arith.constant dense<0.000000e+00> : vector<16x512xf32>
    %15 = tpu.matmul %13, %14, %cst_8 {dimension_numbers = #tpu.dot_dimension_numbers<[1], [0], [0], [1], [0, 0, 1, 1], [], []>} : vector<16x512xbf16>, vector<512x512xbf16>, vector<16x512xf32> -> vector<16x512xf32>
    %c0_9 = arith.constant 0 : index
    %c0_10 = arith.constant 0 : index
    %16 = vector.load %arg5[%c0_9, %c0_10] : memref<1x512xf32, #tpu.memory_space<vmem>>, vector<1x512xf32>
    %17 = vector.broadcast %16 : vector<1x512xf32> to vector<16x512xf32>
    %18 = arith.addf %15, %17 : vector<16x512xf32>
    %cst_11 = arith.constant 0.000000e+00 : f32
    %19 = vector.broadcast %cst_11 : f32 to vector<16x512xf32>
    %20 = arith.maximumf %18, %19 : vector<16x512xf32>
    %21 = arith.truncf %20 : vector<16x512xf32> to vector<16x512xbf16>
    %c0_12 = arith.constant 0 : index
    %c0_13 = arith.constant 0 : index
    %22 = vector.load %arg6[%c0_12, %c0_13] : memref<512x512xbf16, #tpu.memory_space<vmem>>, vector<512x512xbf16>
    %cst_14 = arith.constant dense<0.000000e+00> : vector<16x512xf32>
    %23 = tpu.matmul %21, %22, %cst_14 {dimension_numbers = #tpu.dot_dimension_numbers<[1], [0], [0], [1], [0, 0, 1, 1], [], []>} : vector<16x512xbf16>, vector<512x512xbf16>, vector<16x512xf32> -> vector<16x512xf32>
    %c0_15 = arith.constant 0 : index
    %c0_16 = arith.constant 0 : index
    %24 = vector.load %arg7[%c0_15, %c0_16] : memref<1x512xf32, #tpu.memory_space<vmem>>, vector<1x512xf32>
    %25 = vector.broadcast %24 : vector<1x512xf32> to vector<16x512xf32>
    %26 = arith.addf %23, %25 : vector<16x512xf32>
    %27 = arith.negf %26 : vector<16x512xf32>
    %28 = math.exp %27 : vector<16x512xf32>
    %cst_17 = arith.constant 1.000000e+00 : f32
    %29 = vector.broadcast %cst_17 : f32 to vector<16x512xf32>
    %30 = arith.addf %29, %28 : vector<16x512xf32>
    %31 = arith.divf %29, %30 : vector<16x512xf32>
    %32 = arith.mulf %26, %31 : vector<16x512xf32>
    %33 = arith.truncf %32 : vector<16x512xf32> to vector<16x512xbf16>
    %c0_18 = arith.constant 0 : index
    %c0_19 = arith.constant 0 : index
    %34 = vector.load %arg8[%c0_18, %c0_19] : memref<512x512xbf16, #tpu.memory_space<vmem>>, vector<512x512xbf16>
    %cst_20 = arith.constant dense<0.000000e+00> : vector<16x512xf32>
    %35 = tpu.matmul %33, %34, %cst_20 {dimension_numbers = #tpu.dot_dimension_numbers<[1], [0], [0], [1], [0, 0, 1, 1], [], []>} : vector<16x512xbf16>, vector<512x512xbf16>, vector<16x512xf32> -> vector<16x512xf32>
    %c0_21 = arith.constant 0 : index
    %c0_22 = arith.constant 0 : index
    %36 = vector.load %arg9[%c0_21, %c0_22] : memref<1x512xf32, #tpu.memory_space<vmem>>, vector<1x512xf32>
    %37 = vector.broadcast %36 : vector<1x512xf32> to vector<16x512xf32>
    %38 = arith.addf %35, %37 : vector<16x512xf32>
    %cst_23 = arith.constant 0.000000e+00 : f32
    %39 = vector.broadcast %cst_23 : f32 to vector<16x512xf32>
    %40 = arith.maximumf %38, %39 : vector<16x512xf32>
    %41 = arith.truncf %40 : vector<16x512xf32> to vector<16x512xbf16>
    %c0_24 = arith.constant 0 : index
    %c0_25 = arith.constant 0 : index
    %42 = vector.load %arg10[%c0_24, %c0_25] : memref<512x128xbf16, #tpu.memory_space<vmem>>, vector<512x128xbf16>
    %cst_26 = arith.constant dense<0.000000e+00> : vector<16x128xf32>
    %43 = tpu.matmul %41, %42, %cst_26 {dimension_numbers = #tpu.dot_dimension_numbers<[1], [0], [0], [1], [0, 0, 1, 1], [], []>} : vector<16x512xbf16>, vector<512x128xbf16>, vector<16x128xf32> -> vector<16x128xf32>
    %c0_27 = arith.constant 0 : index
    %c0_28 = arith.constant 0 : index
    %44 = vector.load %arg11[%c0_27, %c0_28] : memref<1x128xf32, #tpu.memory_space<vmem>>, vector<1x128xf32>
    %45 = vector.broadcast %44 : vector<1x128xf32> to vector<16x128xf32>
    %46 = arith.addf %43, %45 : vector<16x128xf32>
    %c0_29 = arith.constant 0 : index
    %c0_30 = arith.constant 0 : index
    %47 = vector.load %arg12[%c0_29, %c0_30] : memref<16x128xf32, #tpu.memory_space<vmem>>, vector<16x128xf32>
    tpu.vector_store %arg12[%c0_29, %c0_30], %46 {strides = array<i32>} : memref<16x128xf32, #tpu.memory_space<vmem>>, vector<16x128xf32>,
    return
  }
  func.func @transform_0(%arg0: i32) -> (i32, i32) {
    %c0_i32 = arith.constant 0 : i32
    %c0_i32_0 = arith.constant 0 : i32
    return %arg0, %c0_i32 : i32, i32
  }
  func.func @transform_1(%arg0: i32) -> (i32, i32) {
    %c0_i32 = arith.constant 0 : i32
    %c0_i32_0 = arith.constant 0 : i32
    %c0_i32_1 = arith.constant 0 : i32
    return %c0_i32, %c0_i32_0 : i32, i32
  }
  func.func @transform_2(%arg0: i32) -> (i32, i32) {
    %c0_i32 = arith.constant 0 : i32
    %c0_i32_0 = arith.constant 0 : i32
    %c0_i32_1 = arith.constant 0 : i32
    return %c0_i32, %c0_i32_0 : i32, i32
  }
  func.func @transform_3(%arg0: i32) -> (i32, i32) {
    %c0_i32 = arith.constant 0 : i32
    %c0_i32_0 = arith.constant 0 : i32
    %c0_i32_1 = arith.constant 0 : i32
    return %c0_i32, %c0_i32_0 : i32, i32
  }
  func.func @transform_4(%arg0: i32) -> (i32, i32) {
    %c0_i32 = arith.constant 0 : i32
    %c0_i32_0 = arith.constant 0 : i32
    %c0_i32_1 = arith.constant 0 : i32
    return %c0_i32, %c0_i32_0 : i32, i32
  }
  func.func @transform_5(%arg0: i32) -> (i32, i32) {
    %c0_i32 = arith.constant 0 : i32
    %c0_i32_0 = arith.constant 0 : i32
    %c0_i32_1 = arith.constant 0 : i32
    return %c0_i32, %c0_i32_0 : i32, i32
  }
  func.func @transform_6(%arg0: i32) -> (i32, i32) {
    %c0_i32 = arith.constant 0 : i32
    %c0_i32_0 = arith.constant 0 : i32
    %c0_i32_1 = arith.constant 0 : i32
    return %c0_i32, %c0_i32_0 : i32, i32
  }
  func.func @transform_7(%arg0: i32) -> (i32, i32) {
    %c0_i32 = arith.constant 0 : i32
    %c0_i32_0 = arith.constant 0 : i32
    %c0_i32_1 = arith.constant 0 : i32
    return %c0_i32, %c0_i32_0 : i32, i32
  }
  func.func @transform_8(%arg0: i32) -> (i32, i32) {
    %c0_i32 = arith.constant 0 : i32
    %c0_i32_0 = arith.constant 0 : i32
    %c0_i32_1 = arith.constant 0 : i32
    return %c0_i32, %c0_i32_0 : i32, i32
  }
  func.func @transform_9(%arg0: i32) -> (i32, i32) {
    %c0_i32 = arith.constant 0 : i32
    %c0_i32_0 = arith.constant 0 : i32
    %c0_i32_1 = arith.constant 0 : i32
    return %c0_i32, %c0_i32_0 : i32, i32
  }
  func.func @transform_10(%arg0: i32) -> (i32, i32) {
    %c0_i32 = arith.constant 0 : i32
    %c0_i32_0 = arith.constant 0 : i32
    %c0_i32_1 = arith.constant 0 : i32
    return %c0_i32, %c0_i32_0 : i32, i32
  }
  func.func @transform_11(%arg0: i32) -> (i32, i32) {
    %c0_i32 = arith.constant 0 : i32
    %c0_i32_0 = arith.constant 0 : i32
    return %arg0, %c0_i32 : i32, i32
  }
}

</mosaic_0001>

<bundles_post_ra>
// kernel: _forward_impl.1
= control target key start
LH: loop header
LB: loop body
LE: loop exit
PB: predicated region body
PF: predicated region fallthrough
CT: control target
= control target key end

     0   :  { %16 = vsyncpa [#allocation3], 0  ;;  %s5147_s0 = inlined_call_operand.vmem [shape: f32[16,8], index: 0, kind: input, shape index: {}]   ;;  %s5148_s1 = inlined_call_operand.vmem [shape: bf16[8,512], index: 1, kind: input, shape index: {}]   ;;  %s5149_s2 = inlined_call_operand.vmem [shape: f32[1,512], index: 2, kind: input, shape index: {}]   ;;  %s5150_s3 = inlined_call_operand.hbm [shape: bf16[512,512], index: 3, kind: input, shape index: {}]   ;;  %s5151_s4 = inlined_call_operand.vmem [shape: f32[1,512], index: 4, kind: input, shape index: {}]   ;;  %s5152_s5 = inlined_call_operand.hbm [shape: bf16[512,512], index: 5, kind: input, shape index: {}]   ;;  %s5153_s6 = inlined_call_operand.vmem [shape: f32[1,512], index: 6, kind: input, shape index: {}]   ;;  %s5154_s7 = inlined_call_operand.hbm [shape: bf16[512,512], index: 7, kind: input, shape index: {}]   ;;  %s5155_s8 = inlined_call_operand.vmem [shape: f32[1,512], index: 8, kind: input, shape index: {}]   ;;  %s5156_s9 = inlined_call_operand.hbm [shape: bf16[512,128], index: 9, kind: input, shape index: {}]   ;;  %s5157_s10 = inlined_call_operand.vmem [shape: f32[1,128], index: 10, kind: input, shape index: {}]   ;;  %s5158_s11 = inlined_call_operand.vmem [shape: f32[16,128], index: 11, kind: output, shape index: {}]  }
   0x1   :  { %17 = vsyncpa [#allocation5], 0 }
   0x2   :  { %18 = vsyncpa [#allocation8], 0  ;;  %s4930_s17 = smov [#allocation4]   ;;  %s4931_s19 = smov [#allocation2]  }
   0x3   :  { %s44_s18 = sshll.u32 %s4930_s17, 4  ;;  %s30_s20 = sshll.u32 %s4931_s19, 4  ;;  %s45_s18 = int_to_ptr.vmem [resolvable:$true] %s44_s18  ;;  %s4999_s20 = int_to_ptr.vmem [resolvable:$true] %s30_s20 }
   0x4   :  { %s4836_s23 = scalar_lea.hbm %s5152_s5, 16384 }
   0x5   :  { %p4837_p0 = scmp.ne.s32.totalorder %s5152_s5, %s4836_s23  ;;  %p4840_p1 = scmp.lt.u32.totalorder %s4836_s23, %s5152_s5 }
   0x7   :  { %p4842_p2 = pnand %p4840_p1, %p4837_p0 }
   0x9   :  { %4845 = shalt.err (!%p4842_p2)
}
   0xa   :  { %s4846_s28 = scalar_lea.vmem %s45_s18, 16384  ;;  %p4851_p4 = scmp.lt.s32.totalorder %s45_s18, %s45_s18 }
   0xb   :  { %p4847_p3 = scmp.ne.s32.totalorder %s45_s18, %s4846_s28  ;;  %p4852_p5 = scmp.lt.s32.totalorder %s4846_s28, %s4846_s28 }
   0xd   :  { %p4853_p6 = por %p4852_p5, %p4851_p4 }
   0xf   :  { %p4854_p7 = pnand %p4853_p6, %p4847_p3 }
  0x11   :  { %4857 = shalt.err (!%p4854_p7)
}
  0x12   :  { %s4932_s29 = smov 256   ;;  %s4933_s30 = smov 16  }
  0x13   :  { %50 = dma.hbm_to_vmem [thread:$0]  %s5152_s5, 16384, %s45_s18, [#allocation5], %s4932_s29, %s4932_s29, %s4933_s30  }
  0x14   :  { %s4858_s16 = scalar_lea.hbm %s5150_s3, 16384 }
  0x15   :  { %p4859_p8 = scmp.ne.s32.totalorder %s5150_s3, %s4858_s16  ;;  %p4862_p9 = scmp.lt.u32.totalorder %s4858_s16, %s5150_s3 }
  0x17   :  { %p4864_p10 = pnand %p4862_p9, %p4859_p8 }
  0x19   :  { %4867 = shalt.err (!%p4864_p10)
}
  0x1a   :  { %s4868_s23 = scalar_lea.vmem %s4999_s20, 16384  ;;  %p4873_p12 = scmp.lt.s32.totalorder %s4999_s20, %s4999_s20 }
  0x1b   :  { %p4869_p11 = scmp.ne.s32.totalorder %s4999_s20, %s4868_s23  ;;  %p4874_p13 = scmp.lt.s32.totalorder %s4868_s23, %s4868_s23 }
  0x1d   :  { %p4875_p0 = por %p4874_p13, %p4873_p12 }
  0x1f   :  { %p4876_p1 = pnand %p4875_p0, %p4869_p11 }
  0x21   :  { %4879 = shalt.err (!%p4876_p1)
}
  0x22   :  { %36 = dma.hbm_to_vmem [thread:$0]  %s5150_s3, 16384, %s4999_s20, [#allocation3], %s4932_s29, %s4932_s29, %s4933_s30  }
  0x23   :  { %s4934_s24 = smov [#allocation6]   ;;  %s4935_s26 = smov [#allocation7]  }
  0x24   :  { %s58_s25 = sshll.u32 %s4934_s24, 4  ;;  %s72_s27 = sshll.u32 %s4935_s26, 4  ;;  %s59_s25 = int_to_ptr.vmem [resolvable:$true] %s58_s25  ;;  %s5036_s27 = int_to_ptr.vmem [resolvable:$true] %s72_s27 }
  0x25   :  { %s4880_s13 = scalar_lea.hbm %s5154_s7, 16384 }
  0x26   :  { %p4881_p2 = scmp.ne.s32.totalorder %s5154_s7, %s4880_s13  ;;  %p4884_p3 = scmp.lt.u32.totalorder %s4880_s13, %s5154_s7 }
  0x28   :  { %p4886_p4 = pnand %p4884_p3, %p4881_p2 }
  0x2a   :  { %4889 = shalt.err (!%p4886_p4)
}
  0x2b   :  { %s4890_s3 = scalar_lea.vmem %s59_s25, 16384  ;;  %p4895_p6 = scmp.lt.s32.totalorder %s59_s25, %s59_s25 }
  0x2c   :  { %p4891_p5 = scmp.ne.s32.totalorder %s59_s25, %s4890_s3  ;;  %p4896_p7 = scmp.lt.s32.totalorder %s4890_s3, %s4890_s3 }
  0x2e   :  { %p4897_p8 = por %p4896_p7, %p4895_p6 }
  0x30   :  { %p4898_p9 = pnand %p4897_p8, %p4891_p5 }
  0x32   :  { %4901 = shalt.err (!%p4898_p9)
}
  0x33   :  { %64 = dma.hbm_to_vmem [thread:$0]  %s5154_s7, 16384, %s59_s25, [#allocation5], %s4932_s29, %s4932_s29, %s4933_s30  }
  0x34   :  { %s4902_s23 = scalar_lea.hbm %s5156_s9, 4096 }
  0x35   :  { %p4903_p10 = scmp.ne.s32.totalorder %s5156_s9, %s4902_s23  ;;  %p4906_p11 = scmp.lt.u32.totalorder %s4902_s23, %s5156_s9 }
  0x37   :  { %p4908_p12 = pnand %p4906_p11, %p4903_p10 }
  0x39   :  { %4911 = shalt.err (!%p4908_p12)
}
  0x3a   :  { %s4912_s28 = scalar_lea.vmem %s5036_s27, 4096  ;;  %p4917_p0 = scmp.lt.s32.totalorder %s5036_s27, %s5036_s27 }
  0x3b   :  { %p4913_p13 = scmp.ne.s32.totalorder %s5036_s27, %s4912_s28  ;;  %p4918_p1 = scmp.lt.s32.totalorder %s4912_s28, %s4912_s28 }
  0x3d   :  { %p4919_p2 = por %p4918_p1, %p4917_p0 }
  0x3f   :  { %p4920_p3 = pnand %p4919_p2, %p4913_p13 }
  0x41   :  { %4923 = shalt.err (!%p4920_p3)
}
  0x42   :  { %s4936_s7 = smov 64   ;;  %s4937_s29 = smov 4  }
  0x43   :  { %78 = dma.hbm_to_vmem [thread:$0]  %s5156_s9, 4096, %s5036_s27, [#allocation8], %s4936_s7, %s4936_s7, %s4937_s29  }
  0x44   :  { %4924 = dma.done.wait [#allocation3], 16384  }
  0x45   :  { %4925 = vsyncadd [#allocation3], 4294950912 }
  0x46   :  { %4926 = dma.done.wait [#allocation5], 32768  }
  0x47   :  { %4927 = vsyncadd [#allocation5], 4294934528 }
  0x48   :  { %4928 = dma.done.wait [#allocation8], 4096  }
  0x49   :  { %4929 = vsyncadd [#allocation8], 4294963200  ;;  %v4938_v0 = vmov 0   ;;  %v97_v1 = vld [vmem:[%s5148_s1] sm:$0xff]  ;;  %vm135_vm0 = vcmask 1043456   ;;  %v95_v3 = vld [vmem:[%s5147_s0 + $0x8] sm:$0xff] }
  0x4a   :  { %180 = vmatprep.mubr.bf16.mxu0 %v4938_v0  ;;  %223 = vmatprep.mubr.bf16.mxu1 %v4938_v0  ;;  %v94_v2 = vld [vmem:[%s5147_s0] sm:$0xff]  ;;  %v3619_v4 = vcombine.high %v97_v1, %v97_v1  ;;  %v3618_v5 = vcombine.low %v97_v1, %v97_v1  ;;  %v98_v6 = vld [vmem:[%s5148_s1 + $0x8] sm:$0xff]  ;;  %vm131_vm1 = vcmask 64512  }
  0x4b   :  { %v3621_v7 = vcombine.high %v98_v6, %v98_v6  ;;  %v3620_v8 = vcombine.low %v98_v6, %v98_v6  ;;  %v4166_v9 = vld [vmem:[#allocation2 + $0x4] ss:$16 sps:$4 sm:$0xff]   ;;  %v96_v11 = vpack.c.bf16 %v95_v3, %v94_v2  ;;  %v4164_v12 = vld [vmem:[#allocation2] ss:$16 sps:$4 sm:$0xff]   ;;  %v4169_v13 = vld [vmem:[#allocation2 + $0xc] ss:$16 sps:$4 sm:$0xff]  }
  0x4c   :  { %3622 = vmatprep.subr.msk.bf16.mxu0 %vm135_vm0, %v3619_v4  ;;  %v137_v10 = vsel %vm135_vm0, %v3618_v5, 0  ;;  %v4167_v15 = vld [vmem:[#allocation2 + $0x8] ss:$16 sps:$4 sm:$0xff]   ;;  %v4172_v16 = vld [vmem:[#allocation2 + $0x24] ss:$16 sps:$4 sm:$0xff]  }
  0x4d   :  { %149 = vmatpush1.bf16.msra.mxu0 %v137_v10  ;;  %3624 = vmatprep.subr.msk.bf16.mxu1 %vm135_vm0, %v3621_v7  ;;  %v143_v14 = vsel %vm135_vm0, %v3620_v8, 0  ;;  %v4175_v17 = vld [vmem:[#allocation2 + $0x2c] ss:$16 sps:$4 sm:$0xff]   ;;  %v4170_v18 = vld [vmem:[#allocation2 + $0x20] ss:$16 sps:$4 sm:$0xff]  }
  0x4e   :  { %192 = vmatpush1.bf16.msra.mxu1 %v143_v14  ;;  %1084 = vmatprep.subr.bf16.mxu0 %v4166_v9  ;;  %v4173_v19 = vld [vmem:[#allocation2 + $0x28] ss:$16 sps:$4 sm:$0xff]   ;;  %v4178_v20 = vld [vmem:[#allocation2 + $0x44] ss:$16 sps:$4 sm:$0xff]   ;;  %v4181_v21 = vld [vmem:[#allocation2 + $0x4c] ss:$16 sps:$4 sm:$0xff]   ;;  %v101_v14 = vlaneseq }
  0x4f   :  { %1170 = vmatprep.subr.bf16.mxu1 %v4169_v13  ;;  %v4176_v22 = vld [vmem:[#allocation2 + $0x40] ss:$16 sps:$4 sm:$0xff]   ;;  %v4179_v23 = vld [vmem:[#allocation2 + $0x48] ss:$16 sps:$4 sm:$0xff]   ;;  %v4184_v24 = vld [vmem:[#allocation2 + $0x64] ss:$16 sps:$4 sm:$0xff]  }
  0x50   :  { %3623 = vmatmul.mubr.msk.bf16.vlgmr.msra.gmra.mrb[0].mxu0 %vm131_vm1, %v96_v11  ;;  %v4187_v25 = vld [vmem:[#allocation2 + $0x6c] ss:$16 sps:$4 sm:$0xff]   ;;  %v4182_v26 = vld [vmem:[#allocation2 + $0x60] ss:$16 sps:$4 sm:$0xff]   ;;  %v4185_v27 = vld [vmem:[#allocation2 + $0x68] ss:$16 sps:$4 sm:$0xff]  }
  0x51   :  { %3625 = vmatmul.mubr.msk.bf16.vlgmr.msra.gmra.mrb[0].mxu1 %vm131_vm1, %v96_v11  ;;  %1085 = vmatpush1.bf16.msra.mxu0 %v4164_v12  ;;  %v4190_v28 = vld [vmem:[#allocation2 + $0x84] ss:$16 sps:$4 sm:$0xff]   ;;  %v4188_v29 = vld [vmem:[#allocation2 + $0x80] ss:$16 sps:$4 sm:$0xff]   ;;  %v4193_v30 = vld [vmem:[#allocation2 + $0x8c] ss:$16 sps:$4 sm:$0xff]  }
  0x52   :  { %1171 = vmatpush1.bf16.msra.mxu1 %v4167_v15  ;;  %1086 = vmatprep.subr.bf16.mxu0 %v4172_v16  ;;  %v4191_v31 = vld [vmem:[#allocation2 + $0x88] ss:$16 sps:$4 sm:$0xff]   ;;  %v4196_v32 = vld [vmem:[#allocation2 + $0xa4] ss:$16 sps:$4 sm:$0xff]   ;;  %v4199_v33 = vld [vmem:[#allocation2 + $0xac] ss:$16 sps:$4 sm:$0xff]  }
  0x53   :  { %1172 = vmatprep.subr.bf16.mxu1 %v4175_v17  ;;  %v4194_v34 = vld [vmem:[#allocation2 + $0xa0] ss:$16 sps:$4 sm:$0xff]   ;;  %v4197_v35 = vld [vmem:[#allocation2 + $0xa8] ss:$16 sps:$4 sm:$0xff]   ;;  %v4202_v36 = vld [vmem:[#allocation2 + $0xc4] ss:$16 sps:$4 sm:$0xff]  }
  0x54   :  { %v4205_v37 = vld [vmem:[#allocation2 + $0xcc] ss:$16 sps:$4 sm:$0xff]   ;;  %v4200_v38 = vld [vmem:[#allocation2 + $0xc0] ss:$16 sps:$4 sm:$0xff]   ;;  %v4203_v39 = vld [vmem:[#allocation2 + $0xc8] ss:$16 sps:$4 sm:$0xff]  }
  0x55   :  { %1087 = vmatpush1.bf16.msra.mxu0 %v4170_v18  ;;  %v4208_v40 = vld [vmem:[#allocation2 + $0xe4] ss:$16 sps:$4 sm:$0xff]   ;;  %v4211_v41 = vld [vmem:[#allocation2 + $0xec] ss:$16 sps:$4 sm:$0xff]   ;;  %v4206_v42 = vld [vmem:[#allocation2 + $0xe0] ss:$16 sps:$4 sm:$0xff]  }
  0x56   :  { %1173 = vmatpush1.bf16.msra.mxu1 %v4173_v19  ;;  %1088 = vmatprep.subr.bf16.mxu0 %v4178_v20  ;;  %v4209_v43 = vld [vmem:[#allocation2 + $0xe8] ss:$16 sps:$4 sm:$0xff]   ;;  %v4214_v44 = vld [vmem:[#allocation2 + $0x104] ss:$16 sps:$4 sm:$0xff]   ;;  %v4217_v45 = vld [vmem:[#allocation2 + $0x10c] ss:$16 sps:$4 sm:$0xff]  }
  0x57   :  { %1174 = vmatprep.subr.bf16.mxu1 %v4181_v21  ;;  %v4212_v46 = vld [vmem:[#allocation2 + $0x100] ss:$16 sps:$4 sm:$0xff]   ;;  %v4215_v47 = vld [vmem:[#allocation2 + $0x108] ss:$16 sps:$4 sm:$0xff]   ;;  %v4220_v48 = vld [vmem:[#allocation2 + $0x124] ss:$16 sps:$4 sm:$0xff]  }
  0x58   :  { %v4223_v49 = vld [vmem:[#allocation2 + $0x12c] ss:$16 sps:$4 sm:$0xff]   ;;  %v4218_v50 = vld [vmem:[#allocation2 + $0x120] ss:$16 sps:$4 sm:$0xff]   ;;  %v4221_v51 = vld [vmem:[#allocation2 + $0x128] ss:$16 sps:$4 sm:$0xff]  }
  0x59   :  { %1089 = vmatpush1.bf16.msra.mxu0 %v4176_v22  ;;  %v4226_v52 = vld [vmem:[#allocation2 + $0x144] ss:$16 sps:$4 sm:$0xff]   ;;  %v4229_v53 = vld [vmem:[#allocation2 + $0x14c] ss:$16 sps:$4 sm:$0xff]   ;;  %v4224_v54 = vld [vmem:[#allocation2 + $0x140] ss:$16 sps:$4 sm:$0xff]  }
  0x5a   :  { %1175 = vmatpush1.bf16.msra.mxu1 %v4179_v23  ;;  %1090 = vmatprep.subr.bf16.mxu0 %v4184_v24  ;;  %v4227_v55 = vld [vmem:[#allocation2 + $0x148] ss:$16 sps:$4 sm:$0xff]   ;;  %v4232_v56 = vld [vmem:[#allocation2 + $0x164] ss:$16 sps:$4 sm:$0xff]   ;;  %v4235_v57 = vld [vmem:[#allocation2 + $0x16c] ss:$16 sps:$4 sm:$0xff]  }
  0x5b   :  { %1176 = vmatprep.subr.bf16.mxu1 %v4187_v25  ;;  %v4230_v58 = vld [vmem:[#allocation2 + $0x160] ss:$16 sps:$4 sm:$0xff]   ;;  %v4233_v59 = vld [vmem:[#allocation2 + $0x168] ss:$16 sps:$4 sm:$0xff]   ;;  %v4238_v60 = vld [vmem:[#allocation2 + $0x184] ss:$16 sps:$4 sm:$0xff]  }
  0x5c   :  { %v4241_v61 = vld [vmem:[#allocation2 + $0x18c] ss:$16 sps:$4 sm:$0xff]   ;;  %v4236_v62 = vld [vmem:[#allocation2 + $0x180] ss:$16 sps:$4 sm:$0xff]   ;;  %v4239_v63 = vld [vmem:[#allocation2 + $0x188] ss:$16 sps:$4 sm:$0xff]  }
  0x5d   :  { %1091 = vmatpush1.bf16.msra.mxu0 %v4182_v26  ;;  %v4244_v0 = vld [vmem:[#allocation2 + $0x1a4] ss:$16 sps:$4 sm:$0xff]   ;;  %v4247_v1 = vld [vmem:[#allocation2 + $0x1ac] ss:$16 sps:$4 sm:$0xff]   ;;  %v4242_v2 = vld [vmem:[#allocation2 + $0x1a0] ss:$16 sps:$4 sm:$0xff]  }
  0x5e   :  { %1177 = vmatpush1.bf16.msra.mxu1 %v4185_v27  ;;  %1092 = vmatprep.subr.bf16.mxu0 %v4190_v28  ;;  %v4245_v3 = vld [vmem:[#allocation2 + $0x1a8] ss:$16 sps:$4 sm:$0xff]   ;;  %v4250_v4 = vld [vmem:[#allocation2 + $0x1c4] ss:$16 sps:$4 sm:$0xff]   ;;  %v4253_v5 = vld [vmem:[#allocation2 + $0x1cc] ss:$16 sps:$4 sm:$0xff]  }
  0x5f   :  { %1178 = vmatprep.subr.bf16.mxu1 %v4193_v30  ;;  %v4248_v6 = vld [vmem:[#allocation2 + $0x1c0] ss:$16 sps:$4 sm:$0xff]   ;;  %v4251_v7 = vld [vmem:[#allocation2 + $0x1c8] ss:$16 sps:$4 sm:$0xff]   ;;  %v4256_v8 = vld [vmem:[#allocation2 + $0x1e4] ss:$16 sps:$4 sm:$0xff]  }
  0x60   :  { %v4259_v9 = vld [vmem:[#allocation2 + $0x1ec] ss:$16 sps:$4 sm:$0xff]   ;;  %v4254_v10 = vld [vmem:[#allocation2 + $0x1e0] ss:$16 sps:$4 sm:$0xff]   ;;  %v4257_v11 = vld [vmem:[#allocation2 + $0x1e8] ss:$16 sps:$4 sm:$0xff]  }
  0x61   :  { %1093 = vmatpush1.bf16.msra.mxu0 %v4188_v29  ;;  %v4262_v12 = vld [vmem:[#allocation2 + $0x204] ss:$16 sps:$4 sm:$0xff]   ;;  %v4265_v13 = vld [vmem:[#allocation2 + $0x20c] ss:$16 sps:$4 sm:$0xff]   ;;  %v102_v15 = vshrl.u32 %v101_v14, 7 }
  0x62   :  { %1179 = vmatpush1.bf16.msra.mxu1 %v4191_v31  ;;  %1094 = vmatprep.subr.bf16.mxu0 %v4196_v32  ;;  %v99_v17 = vld [vmem:[%s5149_s2] sm:$0xf] }
  0x63   :  { %1180 = vmatprep.subr.bf16.mxu1 %v4199_v33  ;;  %v5086_v16 = vsub.s32 0, %v102_v15  ;;  %v5091_v18 = vsub.s32 1, %v102_v15  ;;  %v5093_v19 = vsub.s32 2, %v102_v15  ;;  %v5095_v20 = vsub.s32 3, %v102_v15 }
  0x65   :  { %1095 = vmatpush1.bf16.msra.mxu0 %v4194_v34  ;;  %v104_v21 = vrot.slane %v99_v17, %v5086_v16  ;;  %v108_v22 = vrot.slane %v99_v17, %v5091_v18  ;;  %v112_v23 = vrot.slane %v99_v17, %v5093_v19  ;;  %v116_v24 = vrot.slane %v99_v17, %v5095_v20  ;;  %v4260_v17 = vld [vmem:[#allocation2 + $0x200] ss:$16 sps:$4 sm:$0xff]  }
  0x66   :  { %1181 = vmatpush1.bf16.msra.mxu1 %v4197_v35  ;;  %1096 = vmatprep.subr.bf16.mxu0 %v4202_v36 }
  0x67   :  { %1182 = vmatprep.subr.bf16.mxu1 %v4205_v37 }
  0x69   :  { %1097 = vmatpush1.bf16.msra.mxu0 %v4200_v38 }
  0x6a   :  { %1183 = vmatpush1.bf16.msra.mxu1 %v4203_v39  ;;  %1098 = vmatprep.subr.bf16.mxu0 %v4208_v40 }
  0x6b   :  { %1184 = vmatprep.subr.bf16.mxu1 %v4211_v41 }
  0x6d   :  { %1099 = vmatpush1.bf16.msra.mxu0 %v4206_v42 }
  0x6e   :  { %1185 = vmatpush1.bf16.msra.mxu1 %v4209_v43  ;;  %1100 = vmatprep.subr.bf16.mxu0 %v4214_v44 }
  0x6f   :  { %1186 = vmatprep.subr.bf16.mxu1 %v4217_v45 }
  0x71   :  { %1101 = vmatpush1.bf16.msra.mxu0 %v4212_v46 }
  0x72   :  { %1187 = vmatpush1.bf16.msra.mxu1 %v4215_v47  ;;  %1102 = vmatprep.subr.bf16.mxu0 %v4220_v48 }
  0x73   :  { %1188 = vmatprep.subr.bf16.mxu1 %v4223_v49 }
  0x75   :  { %1103 = vmatpush1.bf16.msra.mxu0 %v4218_v50 }
  0x76   :  { %1189 = vmatpush1.bf16.msra.mxu1 %v4221_v51  ;;  %1104 = vmatprep.subr.bf16.mxu0 %v4226_v52 }
  0x77   :  { %1190 = vmatprep.subr.bf16.mxu1 %v4229_v53 }
  0x79   :  { %1105 = vmatpush1.bf16.msra.mxu0 %v4224_v54 }
  0x7a   :  { %1191 = vmatpush1.bf16.msra.mxu1 %v4227_v55  ;;  %1106 = vmatprep.subr.bf16.mxu0 %v4232_v56 }
  0x7b   :  { %1192 = vmatprep.subr.bf16.mxu1 %v4235_v57 }
  0x7d   :  { %1107 = vmatpush1.bf16.msra.mxu0 %v4230_v58 }
  0x7e   :  { %1193 = vmatpush1.bf16.msra.mxu1 %v4233_v59  ;;  %1108 = vmatprep.subr.bf16.mxu0 %v4238_v60 }
  0x7f   :  { %1194 = vmatprep.subr.bf16.mxu1 %v4241_v61 }
  0x81   :  { %1109 = vmatpush1.bf16.msra.mxu0 %v4236_v62 }
  0x82   :  { %1195 = vmatpush1.bf16.msra.mxu1 %v4239_v63  ;;  %1110 = vmatprep.subr.bf16.mxu0 %v4244_v0 }
  0x83   :  { %1196 = vmatprep.subr.bf16.mxu1 %v4247_v1 }
  0x85   :  { %1111 = vmatpush1.bf16.msra.mxu0 %v4242_v2 }
  0x86   :  { %1197 = vmatpush1.bf16.msra.mxu1 %v4245_v3  ;;  %1112 = vmatprep.subr.bf16.mxu0 %v4250_v4 }
  0x87   :  { %1198 = vmatprep.subr.bf16.mxu1 %v4253_v5 }
  0x89   :  { %1113 = vmatpush1.bf16.msra.mxu0 %v4248_v6 }
  0x8a   :  { %1199 = vmatpush1.bf16.msra.mxu1 %v4251_v7  ;;  %1114 = vmatprep.subr.bf16.mxu0 %v4256_v8 }
  0x8b   :  { %1200 = vmatprep.subr.bf16.mxu1 %v4259_v9 }
  0x8d   :  { %1115 = vmatpush1.bf16.msra.mxu0 %v4254_v10 }
  0x8e   :  { %1201 = vmatpush1.bf16.msra.mxu1 %v4257_v11  ;;  %1127 = vmatprep.subr.bf16.mxu0 %v4262_v12 }
  0x8f   :  { %1213 = vmatprep.subr.bf16.mxu1 %v4265_v13 }
 0x123   :  { %v182_v25 = vpop.f32.mrb[0].mxu0 }
 0x124   :  { %v183_v26 = vadd.f32 %v182_v25, %v104_v21  ;;  %v184_v27 = vpop.f32.mrb[1].mxu0  ;;  %v225_v28 = vpop.f32.mrb[0].mxu1  ;;  %v4271_v25 = vld [vmem:[#allocation2 + $0x22c] ss:$16 sps:$4 sm:$0xff]  }
 0x125   :  { %v185_v29 = vadd.f32 %v184_v27, %v108_v22  ;;  %v186_v30 = vpop.f32.mrb[2].mxu0  ;;  %v226_v31 = vadd.f32 %v225_v28, %v112_v23  ;;  %v227_v32 = vpop.f32.mrb[1].mxu1  ;;  %v4266_v28 = vld [vmem:[#allocation2 + $0x220] ss:$16 sps:$4 sm:$0xff]  }
 0x126   :  { %v3626_v33 = vmul.f32 -1.442695, %v183_v26  ;;  %v187_v34 = vadd.f32 %v186_v30, %v104_v21  ;;  %v188_v35 = vpop.f32.mrb[3].mxu0  ;;  %v228_v36 = vadd.f32 %v227_v32, %v116_v24  ;;  %v229_v37 = vpop.f32.mrb[2].mxu1  ;;  %v4263_v21 = vld [vmem:[#allocation2 + $0x208] ss:$16 sps:$4 sm:$0xff]  }
 0x127   :  { %v3627_v38 = vmul.f32 -1.442695, %v185_v29  ;;  %v189_v39 = vadd.f32 %v188_v35, %v108_v22  ;;  %v230_v40 = vadd.f32 %v229_v37, %v112_v23  ;;  %v231_v41 = vpop.f32.mrb[3].mxu1  ;;  %v3628_v43 = vmul.f32 -1.442695, %v226_v31 }
 0x128   :  { %4772 = vpow2.f32 %v3626_v33  ;;  %v3630_v42 = vmul.f32 -1.442695, %v187_v34  ;;  %v232_v44 = vadd.f32 %v231_v41, %v116_v24  ;;  %v3629_v46 = vmul.f32 -1.442695, %v228_v36  ;;  %v4268_v24 = vld [vmem:[#allocation2 + $0x224] ss:$16 sps:$4 sm:$0xff]  }
 0x129   :  { %4774 = vpow2.f32 %v3627_v38  ;;  %v3631_v45 = vmul.f32 -1.442695, %v189_v39  ;;  %v3632_v47 = vmul.f32 -1.442695, %v230_v40  ;;  %v4277_v32 = vld [vmem:[#allocation2 + $0x24c] ss:$16 sps:$4 sm:$0xff]  }
 0x12a   :  { %4776 = vpow2.f32 %v3630_v42  ;;  %v3633_v48 = vmul.f32 -1.442695, %v232_v44  ;;  %v4272_v33 = vld [vmem:[#allocation2 + $0x240] ss:$16 sps:$4 sm:$0xff]   ;;  %v4280_v35 = vld [vmem:[#allocation2 + $0x264] ss:$16 sps:$4 sm:$0xff]  }
 0x12b   :  { %4778 = vpow2.f32 %v3631_v45  ;;  %v4278_v37 = vld [vmem:[#allocation2 + $0x260] ss:$16 sps:$4 sm:$0xff]   ;;  %v4281_v38 = vld [vmem:[#allocation2 + $0x268] ss:$16 sps:$4 sm:$0xff]  }
 0x12c   :  { %4780 = vpow2.f32 %v3628_v43  ;;  %v4284_v41 = vld [vmem:[#allocation2 + $0x280] ss:$16 sps:$4 sm:$0xff]   ;;  %v4287_v42 = vld [vmem:[#allocation2 + $0x288] ss:$16 sps:$4 sm:$0xff]   ;;  %v4292_v43 = vld [vmem:[#allocation2 + $0x2a4] ss:$16 sps:$4 sm:$0xff]  }
 0x12d   :  { %4782 = vpow2.f32 %v3629_v46  ;;  %v4290_v45 = vld [vmem:[#allocation2 + $0x2a0] ss:$16 sps:$4 sm:$0xff]   ;;  %v4293_v46 = vld [vmem:[#allocation2 + $0x2a8] ss:$16 sps:$4 sm:$0xff]  }
 0x12e   :  { %4784 = vpow2.f32 %v3632_v47  ;;  %v4298_v47 = vld [vmem:[#allocation2 + $0x2c4] ss:$16 sps:$4 sm:$0xff]  }
 0x12f   :  { %4786 = vpow2.f32 %v3633_v48  ;;  %v4301_v48 = vld [vmem:[#allocation2 + $0x2cc] ss:$16 sps:$4 sm:$0xff]  }
 0x132   :  { %v4773_v49 = vpop.eup %4772 }
 0x133   :  { %v4775_v50 = vpop.eup %4774  ;;  %v258_v51 = vadd.f32 1.0, %v4773_v49  ;;  %v4296_v49 = vld [vmem:[#allocation2 + $0x2c0] ss:$16 sps:$4 sm:$0xff]  }
 0x134   :  { %v4777_v52 = vpop.eup %4776  ;;  %v259_v53 = vadd.f32 1.0, %v4775_v50  ;;  %v4299_v50 = vld [vmem:[#allocation2 + $0x2c8] ss:$16 sps:$4 sm:$0xff]  }
 0x135   :  { %v4779_v54 = vpop.eup %4778  ;;  %4788 = vrcp.f32 %v258_v51  ;;  %v262_v55 = vadd.f32 1.0, %v4777_v52  ;;  %v4304_v51 = vld [vmem:[#allocation2 + $0x2e4] ss:$16 sps:$4 sm:$0xff]   ;;  %v4307_v52 = vld [vmem:[#allocation2 + $0x2ec] ss:$16 sps:$4 sm:$0xff]  }
 0x136   :  { %v4781_v56 = vpop.eup %4780  ;;  %4790 = vrcp.f32 %v259_v53  ;;  %v263_v57 = vadd.f32 1.0, %v4779_v54  ;;  %v4302_v53 = vld [vmem:[#allocation2 + $0x2e0] ss:$16 sps:$4 sm:$0xff]   ;;  %v4305_v54 = vld [vmem:[#allocation2 + $0x2e8] ss:$16 sps:$4 sm:$0xff]  }
 0x137   :  { %v4783_v58 = vpop.eup %4782  ;;  %4792 = vrcp.f32 %v262_v55  ;;  %v260_v59 = vadd.f32 1.0, %v4781_v56  ;;  %v4310_v55 = vld [vmem:[#allocation2 + $0x304] ss:$16 sps:$4 sm:$0xff]   ;;  %v4313_v56 = vld [vmem:[#allocation2 + $0x30c] ss:$16 sps:$4 sm:$0xff]  }
 0x138   :  { %v4785_v60 = vpop.eup %4784  ;;  %4794 = vrcp.f32 %v263_v57  ;;  %v261_v61 = vadd.f32 1.0, %v4783_v58  ;;  %v4308_v57 = vld [vmem:[#allocation2 + $0x300] ss:$16 sps:$4 sm:$0xff]   ;;  %v4311_v58 = vld [vmem:[#allocation2 + $0x308] ss:$16 sps:$4 sm:$0xff]  }
 0x139   :  { %v4787_v62 = vpop.eup %4786  ;;  %4796 = vrcp.f32 %v260_v59  ;;  %v264_v63 = vadd.f32 1.0, %v4785_v60  ;;  %v4316_v59 = vld [vmem:[#allocation2 + $0x324] ss:$16 sps:$4 sm:$0xff]   ;;  %v4319_v60 = vld [vmem:[#allocation2 + $0x32c] ss:$16 sps:$4 sm:$0xff]  }
 0x13a   :  { %4798 = vrcp.f32 %v261_v61  ;;  %v265_v0 = vadd.f32 1.0, %v4787_v62  ;;  %v4314_v61 = vld [vmem:[#allocation2 + $0x320] ss:$16 sps:$4 sm:$0xff]   ;;  %v4317_v62 = vld [vmem:[#allocation2 + $0x328] ss:$16 sps:$4 sm:$0xff]  }
 0x13b   :  { %4800 = vrcp.f32 %v264_v63  ;;  %v4322_v63 = vld [vmem:[#allocation2 + $0x344] ss:$16 sps:$4 sm:$0xff]  }
 0x13c   :  { %4802 = vrcp.f32 %v265_v0  ;;  %v4325_v0 = vld [vmem:[#allocation2 + $0x34c] ss:$16 sps:$4 sm:$0xff]  }
 0x13f   :  { %v4789_v1 = vpop.eup %4788 }
 0x140   :  { %v4791_v2 = vpop.eup %4790  ;;  %v282_v5 = vmul.f32 %v4789_v1, %v183_v26  ;;  %v4320_v1 = vld [vmem:[#allocation2 + $0x340] ss:$16 sps:$4 sm:$0xff]  }
 0x141   :  { %v4793_v3 = vpop.eup %4792  ;;  %v283_v8 = vmul.f32 %v4791_v2, %v185_v29  ;;  %v4269_v29 = vld [vmem:[#allocation2 + $0x228] ss:$16 sps:$4 sm:$0xff]  }
 0x142   :  { %v4795_v4 = vpop.eup %4794  ;;  %v286_v6 = vmul.f32 %v4793_v3, %v187_v34  ;;  %v4275_v34 = vld [vmem:[#allocation2 + $0x248] ss:$16 sps:$4 sm:$0xff]   ;;  %v4328_v3 = vld [vmem:[#allocation2 + $0x364] ss:$16 sps:$4 sm:$0xff]  }
 0x143   :  { %v4797_v7 = vpop.eup %4796  ;;  %v287_v9 = vmul.f32 %v4795_v4, %v189_v39  ;;  %v4286_v39 = vld [vmem:[#allocation2 + $0x284] ss:$16 sps:$4 sm:$0xff]   ;;  %v4323_v2 = vld [vmem:[#allocation2 + $0x348] ss:$16 sps:$4 sm:$0xff]   ;;  %v4331_v4 = vld [vmem:[#allocation2 + $0x36c] ss:$16 sps:$4 sm:$0xff]  }
 0x144   :  { %v4799_v10 = vpop.eup %4798  ;;  %v290_v11 = vpack.c.bf16 %v286_v6, %v282_v5  ;;  %v284_v12 = vmul.f32 %v4797_v7, %v226_v31  ;;  %v4274_v31 = vld [vmem:[#allocation2 + $0x244] ss:$16 sps:$4 sm:$0xff]   ;;  %v4326_v5 = vld [vmem:[#allocation2 + $0x360] ss:$16 sps:$4 sm:$0xff]   ;;  %v4329_v6 = vld [vmem:[#allocation2 + $0x368] ss:$16 sps:$4 sm:$0xff]  }
 0x145   :  { %v4801_v13 = vpop.eup %4800  ;;  %v285_v14 = vmul.f32 %v4799_v10, %v228_v36  ;;  %v291_v15 = vpack.c.bf16 %v287_v9, %v283_v8  ;;  %v4283_v36 = vld [vmem:[#allocation2 + $0x26c] ss:$16 sps:$4 sm:$0xff]   ;;  %v4334_v7 = vld [vmem:[#allocation2 + $0x384] ss:$16 sps:$4 sm:$0xff]   ;;  %v4332_v9 = vld [vmem:[#allocation2 + $0x380] ss:$16 sps:$4 sm:$0xff]  }
 0x146   :  { %v4803_v22 = vpop.eup %4802  ;;  %v288_v23 = vmul.f32 %v4801_v13, %v230_v40  ;;  %v4289_v40 = vld [vmem:[#allocation2 + $0x28c] ss:$16 sps:$4 sm:$0xff]   ;;  %v4335_v10 = vld [vmem:[#allocation2 + $0x388] ss:$16 sps:$4 sm:$0xff]   ;;  %v4338_v13 = vld [vmem:[#allocation2 + $0x3a0] ss:$16 sps:$4 sm:$0xff]  }
 0x147   :  { %1116 = vmatprep.mubr.bf16.mxu0 %v291_v15  ;;  %1202 = vmatprep.mubr.bf16.mxu1 %v291_v15  ;;  %v289_v27 = vmul.f32 %v4803_v22, %v232_v44  ;;  %v4295_v44 = vld [vmem:[#allocation2 + $0x2ac] ss:$16 sps:$4 sm:$0xff]   ;;  %v4346_v15 = vld [vmem:[#allocation2 + $0x3c4] ss:$16 sps:$4 sm:$0xff]   ;;  %v4347_v22 = vld [vmem:[#allocation2 + $0x3c8] ss:$16 sps:$4 sm:$0xff]  }
 0x148   :  { %v5101_v26 = vpack.c.bf16 %v288_v23, %v284_v12  ;;  %1117 = vmatmul.mubr.bf16.vlgmr.msra.gmra.mrb[4].mxu0 %v290_v11  ;;  %1203 = vmatmul.mubr.bf16.vlgmr.msra.gmra.mrb[4].mxu1 %v290_v11  ;;  %v4337_v8 = vld [vmem:[#allocation2 + $0x38c] ss:$16 sps:$4 sm:$0xff]   ;;  %v4340_v11 = vld [vmem:[#allocation2 + $0x3a4] ss:$16 sps:$4 sm:$0xff]  }
 0x149   :  { %1128 = vmatpush1.bf16.msra.mxu0 %v4260_v17  ;;  %1214 = vmatpush1.bf16.msra.mxu1 %v4263_v21  ;;  %v293_v30 = vpack.c.bf16 %v289_v27, %v285_v14  ;;  %v4343_v12 = vld [vmem:[#allocation2 + $0x3ac] ss:$16 sps:$4 sm:$0xff]   ;;  %v4341_v14 = vld [vmem:[#allocation2 + $0x3a8] ss:$16 sps:$4 sm:$0xff]   ;;  %v4344_v21 = vld [vmem:[#allocation2 + $0x3c0] ss:$16 sps:$4 sm:$0xff]  }
 0x14a   :  { %1129 = vmatprep.subr.bf16.mxu0 %v4268_v24  ;;  %1215 = vmatprep.subr.bf16.mxu1 %v4271_v25  ;;  %v4349_v17 = vld [vmem:[#allocation2 + $0x3cc] ss:$16 sps:$4 sm:$0xff]   ;;  %v4352_v23 = vld [vmem:[#allocation2 + $0x3e4] ss:$16 sps:$4 sm:$0xff]   ;;  %v4350_v25 = vld [vmem:[#allocation2 + $0x3e0] ss:$16 sps:$4 sm:$0xff]  }
 0x14b   :  { %1159 = vmatprep.mubr.bf16.mxu0 %v293_v30  ;;  %1245 = vmatprep.mubr.bf16.mxu1 %v293_v30  ;;  %v4355_v24 = vld [vmem:[#allocation2 + $0x3ec] ss:$16 sps:$4 sm:$0xff]   ;;  %v4353_v27 = vld [vmem:[#allocation2 + $0x3e8] ss:$16 sps:$4 sm:$0xff]   ;;  %v4356_v30 = vld [vmem:[#allocation4] ss:$16 sps:$4 sm:$0xff]  }
 0x14d   :  { %1130 = vmatpush1.bf16.msra.mxu0 %v4266_v28  ;;  %1216 = vmatpush1.bf16.msra.mxu1 %v4269_v29  ;;  %v4358_v28 = vld [vmem:[#allocation4 + $0x4] ss:$16 sps:$4 sm:$0xff]   ;;  %v4361_v29 = vld [vmem:[#allocation4 + $0xc] ss:$16 sps:$4 sm:$0xff]  }
 0x14e   :  { %1131 = vmatprep.subr.bf16.mxu0 %v4274_v31  ;;  %1217 = vmatprep.subr.bf16.mxu1 %v4277_v32  ;;  %v4359_v31 = vld [vmem:[#allocation4 + $0x8] ss:$16 sps:$4 sm:$0xff]   ;;  %v4364_v32 = vld [vmem:[#allocation4 + $0x24] ss:$16 sps:$4 sm:$0xff]  }
 0x151   :  { %1132 = vmatpush1.bf16.msra.mxu0 %v4272_v33  ;;  %1218 = vmatpush1.bf16.msra.mxu1 %v4275_v34  ;;  %v4367_v33 = vld [vmem:[#allocation4 + $0x2c] ss:$16 sps:$4 sm:$0xff]   ;;  %v4362_v34 = vld [vmem:[#allocation4 + $0x20] ss:$16 sps:$4 sm:$0xff]  }
 0x152   :  { %1133 = vmatprep.subr.bf16.mxu0 %v4280_v35  ;;  %1219 = vmatprep.subr.bf16.mxu1 %v4283_v36  ;;  %v4365_v35 = vld [vmem:[#allocation4 + $0x28] ss:$16 sps:$4 sm:$0xff]   ;;  %v4370_v36 = vld [vmem:[#allocation4 + $0x44] ss:$16 sps:$4 sm:$0xff]  }
 0x155   :  { %1134 = vmatpush1.bf16.msra.mxu0 %v4278_v37  ;;  %1220 = vmatpush1.bf16.msra.mxu1 %v4281_v38  ;;  %v4373_v37 = vld [vmem:[#allocation4 + $0x4c] ss:$16 sps:$4 sm:$0xff]   ;;  %v4368_v38 = vld [vmem:[#allocation4 + $0x40] ss:$16 sps:$4 sm:$0xff]  }
 0x156   :  { %1135 = vmatprep.subr.bf16.mxu0 %v4286_v39  ;;  %1221 = vmatprep.subr.bf16.mxu1 %v4289_v40  ;;  %v4371_v39 = vld [vmem:[#allocation4 + $0x48] ss:$16 sps:$4 sm:$0xff]   ;;  %v4376_v40 = vld [vmem:[#allocation4 + $0x64] ss:$16 sps:$4 sm:$0xff]  }
 0x159   :  { %1136 = vmatpush1.bf16.msra.mxu0 %v4284_v41  ;;  %1222 = vmatpush1.bf16.msra.mxu1 %v4287_v42  ;;  %v4379_v41 = vld [vmem:[#allocation4 + $0x6c] ss:$16 sps:$4 sm:$0xff]   ;;  %v4374_v42 = vld [vmem:[#allocation4 + $0x60] ss:$16 sps:$4 sm:$0xff]  }
 0x15a   :  { %1137 = vmatprep.subr.bf16.mxu0 %v4292_v43  ;;  %1223 = vmatprep.subr.bf16.mxu1 %v4295_v44  ;;  %v4382_v43 = vld [vmem:[#allocation4 + $0x84] ss:$16 sps:$4 sm:$0xff]   ;;  %v4385_v44 = vld [vmem:[#allocation4 + $0x8c] ss:$16 sps:$4 sm:$0xff]  }
 0x15d   :  { %1138 = vmatpush1.bf16.msra.mxu0 %v4290_v45  ;;  %1224 = vmatpush1.bf16.msra.mxu1 %v4293_v46  ;;  %v4380_v45 = vld [vmem:[#allocation4 + $0x80] ss:$16 sps:$4 sm:$0xff]   ;;  %v4383_v46 = vld [vmem:[#allocation4 + $0x88] ss:$16 sps:$4 sm:$0xff]  }
 0x15e   :  { %1139 = vmatprep.subr.bf16.mxu0 %v4298_v47  ;;  %1225 = vmatprep.subr.bf16.mxu1 %v4301_v48  ;;  %v4388_v47 = vld [vmem:[#allocation4 + $0xa4] ss:$16 sps:$4 sm:$0xff]   ;;  %v4391_v48 = vld [vmem:[#allocation4 + $0xac] ss:$16 sps:$4 sm:$0xff]  }
 0x161   :  { %1140 = vmatpush1.bf16.msra.mxu0 %v4296_v49  ;;  %1226 = vmatpush1.bf16.msra.mxu1 %v4299_v50  ;;  %v4386_v49 = vld [vmem:[#allocation4 + $0xa0] ss:$16 sps:$4 sm:$0xff]   ;;  %v4389_v50 = vld [vmem:[#allocation4 + $0xa8] ss:$16 sps:$4 sm:$0xff]  }
 0x162   :  { %1141 = vmatprep.subr.bf16.mxu0 %v4304_v51  ;;  %1227 = vmatprep.subr.bf16.mxu1 %v4307_v52  ;;  %v4394_v51 = vld [vmem:[#allocation4 + $0xc4] ss:$16 sps:$4 sm:$0xff]   ;;  %v4397_v52 = vld [vmem:[#allocation4 + $0xcc] ss:$16 sps:$4 sm:$0xff]  }
 0x165   :  { %1142 = vmatpush1.bf16.msra.mxu0 %v4302_v53  ;;  %1228 = vmatpush1.bf16.msra.mxu1 %v4305_v54  ;;  %v4392_v53 = vld [vmem:[#allocation4 + $0xc0] ss:$16 sps:$4 sm:$0xff]   ;;  %v4395_v54 = vld [vmem:[#allocation4 + $0xc8] ss:$16 sps:$4 sm:$0xff]  }
 0x166   :  { %1143 = vmatprep.subr.bf16.mxu0 %v4310_v55  ;;  %1229 = vmatprep.subr.bf16.mxu1 %v4313_v56  ;;  %v4400_v55 = vld [vmem:[#allocation4 + $0xe4] ss:$16 sps:$4 sm:$0xff]   ;;  %v4403_v56 = vld [vmem:[#allocation4 + $0xec] ss:$16 sps:$4 sm:$0xff]  }
 0x169   :  { %1144 = vmatpush1.bf16.msra.mxu0 %v4308_v57  ;;  %1230 = vmatpush1.bf16.msra.mxu1 %v4311_v58  ;;  %v4398_v57 = vld [vmem:[#allocation4 + $0xe0] ss:$16 sps:$4 sm:$0xff]   ;;  %v4401_v58 = vld [vmem:[#allocation4 + $0xe8] ss:$16 sps:$4 sm:$0xff]  }
 0x16a   :  { %1145 = vmatprep.subr.bf16.mxu0 %v4316_v59  ;;  %1231 = vmatprep.subr.bf16.mxu1 %v4319_v60  ;;  %v4406_v59 = vld [vmem:[#allocation4 + $0x104] ss:$16 sps:$4 sm:$0xff]   ;;  %v4409_v60 = vld [vmem:[#allocation4 + $0x10c] ss:$16 sps:$4 sm:$0xff]  }
 0x16d   :  { %1146 = vmatpush1.bf16.msra.mxu0 %v4314_v61  ;;  %1232 = vmatpush1.bf16.msra.mxu1 %v4317_v62  ;;  %v4404_v61 = vld [vmem:[#allocation4 + $0x100] ss:$16 sps:$4 sm:$0xff]   ;;  %v4407_v62 = vld [vmem:[#allocation4 + $0x108] ss:$16 sps:$4 sm:$0xff]  }
 0x16e   :  { %1147 = vmatprep.subr.bf16.mxu0 %v4322_v63  ;;  %1233 = vmatprep.subr.bf16.mxu1 %v4325_v0  ;;  %v4412_v63 = vld [vmem:[#allocation4 + $0x124] ss:$16 sps:$4 sm:$0xff]   ;;  %v4415_v0 = vld [vmem:[#allocation4 + $0x12c] ss:$16 sps:$4 sm:$0xff]  }
 0x171   :  { %1148 = vmatpush1.bf16.msra.mxu0 %v4320_v1  ;;  %1234 = vmatpush1.bf16.msra.mxu1 %v4323_v2  ;;  %v4410_v1 = vld [vmem:[#allocation4 + $0x120] ss:$16 sps:$4 sm:$0xff]   ;;  %v4413_v2 = vld [vmem:[#allocation4 + $0x128] ss:$16 sps:$4 sm:$0xff]  }
 0x172   :  { %1149 = vmatprep.subr.bf16.mxu0 %v4328_v3  ;;  %1235 = vmatprep.subr.bf16.mxu1 %v4331_v4  ;;  %v4418_v3 = vld [vmem:[#allocation4 + $0x144] ss:$16 sps:$4 sm:$0xff]   ;;  %v4421_v4 = vld [vmem:[#allocation4 + $0x14c] ss:$16 sps:$4 sm:$0xff]  }
 0x175   :  { %1150 = vmatpush1.bf16.msra.mxu0 %v4326_v5  ;;  %1236 = vmatpush1.bf16.msra.mxu1 %v4329_v6  ;;  %v4416_v5 = vld [vmem:[#allocation4 + $0x140] ss:$16 sps:$4 sm:$0xff]   ;;  %v4419_v6 = vld [vmem:[#allocation4 + $0x148] ss:$16 sps:$4 sm:$0xff]  }
 0x176   :  { %1151 = vmatprep.subr.bf16.mxu0 %v4334_v7  ;;  %1237 = vmatprep.subr.bf16.mxu1 %v4337_v8  ;;  %v4424_v7 = vld [vmem:[#allocation4 + $0x164] ss:$16 sps:$4 sm:$0xff]   ;;  %v4427_v8 = vld [vmem:[#allocation4 + $0x16c] ss:$16 sps:$4 sm:$0xff]  }
 0x179   :  { %1152 = vmatpush1.bf16.msra.mxu0 %v4332_v9  ;;  %1238 = vmatpush1.bf16.msra.mxu1 %v4335_v10  ;;  %v4422_v9 = vld [vmem:[#allocation4 + $0x160] ss:$16 sps:$4 sm:$0xff]   ;;  %v4425_v10 = vld [vmem:[#allocation4 + $0x168] ss:$16 sps:$4 sm:$0xff]  }
 0x17a   :  { %1153 = vmatprep.subr.bf16.mxu0 %v4340_v11  ;;  %1239 = vmatprep.subr.bf16.mxu1 %v4343_v12  ;;  %v4430_v11 = vld [vmem:[#allocation4 + $0x184] ss:$16 sps:$4 sm:$0xff]   ;;  %v4433_v12 = vld [vmem:[#allocation4 + $0x18c] ss:$16 sps:$4 sm:$0xff]  }
 0x17d   :  { %1154 = vmatpush1.bf16.msra.mxu0 %v4338_v13  ;;  %1240 = vmatpush1.bf16.msra.mxu1 %v4341_v14  ;;  %v4428_v13 = vld [vmem:[#allocation4 + $0x180] ss:$16 sps:$4 sm:$0xff]   ;;  %v4431_v14 = vld [vmem:[#allocation4 + $0x188] ss:$16 sps:$4 sm:$0xff]  }
 0x17e   :  { %1155 = vmatprep.subr.bf16.mxu0 %v4346_v15  ;;  %1241 = vmatprep.subr.bf16.mxu1 %v4349_v17  ;;  %v4436_v15 = vld [vmem:[#allocation4 + $0x1a4] ss:$16 sps:$4 sm:$0xff]   ;;  %v4439_v17 = vld [vmem:[#allocation4 + $0x1ac] ss:$16 sps:$4 sm:$0xff]  }
 0x181   :  { %1156 = vmatpush1.bf16.msra.mxu0 %v4344_v21  ;;  %1242 = vmatpush1.bf16.msra.mxu1 %v4347_v22  ;;  %v4434_v21 = vld [vmem:[#allocation4 + $0x1a0] ss:$16 sps:$4 sm:$0xff]   ;;  %v4437_v22 = vld [vmem:[#allocation4 + $0x1a8] ss:$16 sps:$4 sm:$0xff]  }
 0x182   :  { %1157 = vmatprep.subr.bf16.mxu0 %v4352_v23  ;;  %1243 = vmatprep.subr.bf16.mxu1 %v4355_v24  ;;  %v4442_v23 = vld [vmem:[#allocation4 + $0x1c4] ss:$16 sps:$4 sm:$0xff]   ;;  %v4445_v24 = vld [vmem:[#allocation4 + $0x1cc] ss:$16 sps:$4 sm:$0xff]  }
 0x185   :  { %1158 = vmatpush1.bf16.msra.mxu0 %v4350_v25  ;;  %1244 = vmatpush1.bf16.msra.mxu1 %v4353_v27  ;;  %v4440_v25 = vld [vmem:[#allocation4 + $0x1c0] ss:$16 sps:$4 sm:$0xff]   ;;  %v4443_v27 = vld [vmem:[#allocation4 + $0x1c8] ss:$16 sps:$4 sm:$0xff]  }
 0x186   :  { %2058 = vmatprep.subr.bf16.mxu0 %v4358_v28  ;;  %2144 = vmatprep.subr.bf16.mxu1 %v4361_v29  ;;  %v4448_v28 = vld [vmem:[#allocation4 + $0x1e4] ss:$16 sps:$4 sm:$0xff]   ;;  %v4451_v29 = vld [vmem:[#allocation4 + $0x1ec] ss:$16 sps:$4 sm:$0xff]  }
 0x188   :  { %1160 = vmatmul.mubr.bf16.vlgmr.msra.gmra.mrb[4].mxu0 %v5101_v26  ;;  %1246 = vmatmul.mubr.bf16.vlgmr.msra.gmra.mrb[4].mxu1 %v5101_v26  ;;  %v4377_v26 = vld [vmem:[#allocation4 + $0x68] ss:$16 sps:$4 sm:$0xff]  }
 0x189   :  { %2059 = vmatpush1.bf16.msra.mxu0 %v4356_v30  ;;  %2145 = vmatpush1.bf16.msra.mxu1 %v4359_v31  ;;  %v4446_v30 = vld [vmem:[#allocation4 + $0x1e0] ss:$16 sps:$4 sm:$0xff]   ;;  %v4449_v31 = vld [vmem:[#allocation4 + $0x1e8] ss:$16 sps:$4 sm:$0xff]  }
 0x18a   :  { %2060 = vmatprep.subr.bf16.mxu0 %v4364_v32  ;;  %2146 = vmatprep.subr.bf16.mxu1 %v4367_v33  ;;  %v4454_v32 = vld [vmem:[#allocation4 + $0x204] ss:$16 sps:$4 sm:$0xff]   ;;  %v4457_v33 = vld [vmem:[#allocation4 + $0x20c] ss:$16 sps:$4 sm:$0xff]  }
 0x18d   :  { %2061 = vmatpush1.bf16.msra.mxu0 %v4362_v34  ;;  %2147 = vmatpush1.bf16.msra.mxu1 %v4365_v35  ;;  %v422_v34 = vld [vmem:[%s5151_s4] sm:$0xf] }
 0x18e   :  { %2062 = vmatprep.subr.bf16.mxu0 %v4370_v36  ;;  %2148 = vmatprep.subr.bf16.mxu1 %v4373_v37  ;;  %v427_v35 = vrot.slane %v422_v34, %v5086_v16  ;;  %v435_v36 = vrot.slane %v422_v34, %v5093_v19  ;;  %v431_v37 = vrot.slane %v422_v34, %v5091_v18 }
 0x191   :  { %2063 = vmatpush1.bf16.msra.mxu0 %v4368_v38  ;;  %2149 = vmatpush1.bf16.msra.mxu1 %v4371_v39  ;;  %v439_v38 = vrot.slane %v422_v34, %v5095_v20  ;;  %v4499_v34 = vld [vmem:[#allocation4 + $0x2ec] ss:$16 sps:$4 sm:$0xff]  }
 0x192   :  { %2064 = vmatprep.subr.bf16.mxu0 %v4376_v40  ;;  %2150 = vmatprep.subr.bf16.mxu1 %v4379_v41 }
 0x195   :  { %2065 = vmatpush1.bf16.msra.mxu0 %v4374_v42  ;;  %2151 = vmatpush1.bf16.msra.mxu1 %v4377_v26 }
 0x196   :  { %2066 = vmatprep.subr.bf16.mxu0 %v4382_v43  ;;  %2152 = vmatprep.subr.bf16.mxu1 %v4385_v44 }
 0x199   :  { %2067 = vmatpush1.bf16.msra.mxu0 %v4380_v45  ;;  %2153 = vmatpush1.bf16.msra.mxu1 %v4383_v46 }
 0x19a   :  { %2068 = vmatprep.subr.bf16.mxu0 %v4388_v47  ;;  %2154 = vmatprep.subr.bf16.mxu1 %v4391_v48 }
 0x19d   :  { %2069 = vmatpush1.bf16.msra.mxu0 %v4386_v49  ;;  %2155 = vmatpush1.bf16.msra.mxu1 %v4389_v50 }
 0x19e   :  { %2070 = vmatprep.subr.bf16.mxu0 %v4394_v51  ;;  %2156 = vmatprep.subr.bf16.mxu1 %v4397_v52 }
 0x1a1   :  { %2071 = vmatpush1.bf16.msra.mxu0 %v4392_v53  ;;  %2157 = vmatpush1.bf16.msra.mxu1 %v4395_v54 }
 0x1a2   :  { %2072 = vmatprep.subr.bf16.mxu0 %v4400_v55  ;;  %2158 = vmatprep.subr.bf16.mxu1 %v4403_v56 }
 0x1a5   :  { %2073 = vmatpush1.bf16.msra.mxu0 %v4398_v57  ;;  %2159 = vmatpush1.bf16.msra.mxu1 %v4401_v58 }
 0x1a6   :  { %2074 = vmatprep.subr.bf16.mxu0 %v4406_v59  ;;  %2160 = vmatprep.subr.bf16.mxu1 %v4409_v60 }
 0x1a9   :  { %2075 = vmatpush1.bf16.msra.mxu0 %v4404_v61  ;;  %2161 = vmatpush1.bf16.msra.mxu1 %v4407_v62 }
 0x1aa   :  { %2076 = vmatprep.subr.bf16.mxu0 %v4412_v63  ;;  %2162 = vmatprep.subr.bf16.mxu1 %v4415_v0 }
 0x1ad   :  { %2077 = vmatpush1.bf16.msra.mxu0 %v4410_v1  ;;  %2163 = vmatpush1.bf16.msra.mxu1 %v4413_v2  ;;  %v4452_v2 = vld [vmem:[#allocation4 + $0x200] ss:$16 sps:$4 sm:$0xff]  }
 0x1ae   :  { %2078 = vmatprep.subr.bf16.mxu0 %v4418_v3  ;;  %2164 = vmatprep.subr.bf16.mxu1 %v4421_v4  ;;  %v4455_v3 = vld [vmem:[#allocation4 + $0x208] ss:$16 sps:$4 sm:$0xff]   ;;  %v4460_v4 = vld [vmem:[#allocation4 + $0x224] ss:$16 sps:$4 sm:$0xff]  }
 0x1b1   :  { %2079 = vmatpush1.bf16.msra.mxu0 %v4416_v5  ;;  %2165 = vmatpush1.bf16.msra.mxu1 %v4419_v6  ;;  %v4463_v5 = vld [vmem:[#allocation4 + $0x22c] ss:$16 sps:$4 sm:$0xff]   ;;  %v4458_v6 = vld [vmem:[#allocation4 + $0x220] ss:$16 sps:$4 sm:$0xff]  }
 0x1b2   :  { %2080 = vmatprep.subr.bf16.mxu0 %v4424_v7  ;;  %2166 = vmatprep.subr.bf16.mxu1 %v4427_v8  ;;  %v4461_v7 = vld [vmem:[#allocation4 + $0x228] ss:$16 sps:$4 sm:$0xff]   ;;  %v4466_v8 = vld [vmem:[#allocation4 + $0x244] ss:$16 sps:$4 sm:$0xff]  }
 0x1b5   :  { %2081 = vmatpush1.bf16.msra.mxu0 %v4422_v9  ;;  %2167 = vmatpush1.bf16.msra.mxu1 %v4425_v10  ;;  %v4469_v9 = vld [vmem:[#allocation4 + $0x24c] ss:$16 sps:$4 sm:$0xff]   ;;  %v4464_v10 = vld [vmem:[#allocation4 + $0x240] ss:$16 sps:$4 sm:$0xff]  }
 0x1b6   :  { %2082 = vmatprep.subr.bf16.mxu0 %v4430_v11  ;;  %2168 = vmatprep.subr.bf16.mxu1 %v4433_v12  ;;  %v4467_v11 = vld [vmem:[#allocation4 + $0x248] ss:$16 sps:$4 sm:$0xff]   ;;  %v4472_v12 = vld [vmem:[#allocation4 + $0x264] ss:$16 sps:$4 sm:$0xff]  }
 0x1b9   :  { %2083 = vmatpush1.bf16.msra.mxu0 %v4428_v13  ;;  %2169 = vmatpush1.bf16.msra.mxu1 %v4431_v14  ;;  %v4475_v13 = vld [vmem:[#allocation4 + $0x26c] ss:$16 sps:$4 sm:$0xff]   ;;  %v4470_v14 = vld [vmem:[#allocation4 + $0x260] ss:$16 sps:$4 sm:$0xff]  }
 0x1ba   :  { %2084 = vmatprep.subr.bf16.mxu0 %v4436_v15  ;;  %2170 = vmatprep.subr.bf16.mxu1 %v4439_v17  ;;  %v4473_v15 = vld [vmem:[#allocation4 + $0x268] ss:$16 sps:$4 sm:$0xff]   ;;  %v4478_v17 = vld [vmem:[#allocation4 + $0x284] ss:$16 sps:$4 sm:$0xff]  }
 0x1bd   :  { %2085 = vmatpush1.bf16.msra.mxu0 %v4434_v21  ;;  %2171 = vmatpush1.bf16.msra.mxu1 %v4437_v22  ;;  %v4481_v21 = vld [vmem:[#allocation4 + $0x28c] ss:$16 sps:$4 sm:$0xff]   ;;  %v4476_v22 = vld [vmem:[#allocation4 + $0x280] ss:$16 sps:$4 sm:$0xff]  }
 0x1be   :  { %2086 = vmatprep.subr.bf16.mxu0 %v4442_v23  ;;  %2172 = vmatprep.subr.bf16.mxu1 %v4445_v24  ;;  %v4479_v23 = vld [vmem:[#allocation4 + $0x288] ss:$16 sps:$4 sm:$0xff]   ;;  %v4484_v24 = vld [vmem:[#allocation4 + $0x2a4] ss:$16 sps:$4 sm:$0xff]  }
 0x1c1   :  { %2087 = vmatpush1.bf16.msra.mxu0 %v4440_v25  ;;  %2173 = vmatpush1.bf16.msra.mxu1 %v4443_v27  ;;  %v4487_v25 = vld [vmem:[#allocation4 + $0x2ac] ss:$16 sps:$4 sm:$0xff]   ;;  %v4482_v27 = vld [vmem:[#allocation4 + $0x2a0] ss:$16 sps:$4 sm:$0xff]  }
 0x1c2   :  { %2088 = vmatprep.subr.bf16.mxu0 %v4448_v28  ;;  %2174 = vmatprep.subr.bf16.mxu1 %v4451_v29  ;;  %v4485_v28 = vld [vmem:[#allocation4 + $0x2a8] ss:$16 sps:$4 sm:$0xff]   ;;  %v4490_v29 = vld [vmem:[#allocation4 + $0x2c4] ss:$16 sps:$4 sm:$0xff]  }
 0x1c5   :  { %2089 = vmatpush1.bf16.msra.mxu0 %v4446_v30  ;;  %2175 = vmatpush1.bf16.msra.mxu1 %v4449_v31  ;;  %v4493_v30 = vld [vmem:[#allocation4 + $0x2cc] ss:$16 sps:$4 sm:$0xff]   ;;  %v4488_v31 = vld [vmem:[#allocation4 + $0x2c0] ss:$16 sps:$4 sm:$0xff]  }
 0x1c6   :  { %2101 = vmatprep.subr.bf16.mxu0 %v4454_v32  ;;  %2187 = vmatprep.subr.bf16.mxu1 %v4457_v33  ;;  %v4491_v32 = vld [vmem:[#allocation4 + $0x2c8] ss:$16 sps:$4 sm:$0xff]   ;;  %v4496_v33 = vld [vmem:[#allocation4 + $0x2e4] ss:$16 sps:$4 sm:$0xff]  }
 0x25b   :  { %v1161_v39 = vpop.f32.mrb[4].mxu0  ;;  %v1247_v40 = vpop.f32.mrb[4].mxu1 }
 0x25c   :  { %v4103_v41 = vadd.f32 %v1161_v39, %v427_v35  ;;  %v4107_v42 = vadd.f32 %v1247_v40, %v435_v36  ;;  %v1163_v26 = vpop.f32.mrb[5].mxu0  ;;  %v1249_v43 = vpop.f32.mrb[5].mxu1  ;;  %v4500_v39 = vld [vmem:[#allocation4 + $0x300] ss:$16 sps:$4 sm:$0xff]   ;;  %v4503_v40 = vld [vmem:[#allocation4 + $0x308] ss:$16 sps:$4 sm:$0xff]  }
 0x25d   :  { %v4104_v44 = vadd.f32 %v1163_v26, %v431_v37  ;;  %v4108_v45 = vadd.f32 %v1249_v43, %v439_v38  ;;  %v1165_v46 = vpop.f32.mrb[6].mxu0  ;;  %v1251_v47 = vpop.f32.mrb[6].mxu1  ;;  %v4506_v26 = vld [vmem:[#allocation4 + $0x320] ss:$16 sps:$4 sm:$0xff]   ;;  %v4509_v43 = vld [vmem:[#allocation4 + $0x328] ss:$16 sps:$4 sm:$0xff]  }
 0x25e   :  { %v4105_v48 = vadd.f32 %v1165_v46, %v427_v35  ;;  %v4109_v49 = vadd.f32 %v1251_v47, %v435_v36  ;;  %v1167_v50 = vpop.f32.mrb[7].mxu0  ;;  %v1253_v51 = vpop.f32.mrb[7].mxu1  ;;  %v1256_v54 = vmax.f32 %v4103_v41, 0.0  ;;  %v1258_v55 = vmax.f32 %v4107_v42, 0.0  ;;  %v4494_v35 = vld [vmem:[#allocation4 + $0x2e0] ss:$16 sps:$4 sm:$0xff]  }
 0x25f   :  { %v4106_v52 = vadd.f32 %v1167_v50, %v431_v37  ;;  %v4110_v53 = vadd.f32 %v1253_v51, %v439_v38  ;;  %v1257_v58 = vmax.f32 %v4104_v44, 0.0  ;;  %v1259_v59 = vmax.f32 %v4108_v45, 0.0  ;;  %v4497_v36 = vld [vmem:[#allocation4 + $0x2e8] ss:$16 sps:$4 sm:$0xff]   ;;  %v4502_v37 = vld [vmem:[#allocation4 + $0x304] ss:$16 sps:$4 sm:$0xff]  }
 0x260   :  { %v1260_v56 = vmax.f32 %v4105_v48, 0.0  ;;  %v1262_v57 = vmax.f32 %v4109_v49, 0.0  ;;  %v4505_v38 = vld [vmem:[#allocation4 + $0x30c] ss:$16 sps:$4 sm:$0xff]   ;;  %v4508_v41 = vld [vmem:[#allocation4 + $0x324] ss:$16 sps:$4 sm:$0xff]  }
 0x261   :  { %v1261_v60 = vmax.f32 %v4106_v52, 0.0  ;;  %v1263_v61 = vmax.f32 %v4110_v53, 0.0  ;;  %v4511_v42 = vld [vmem:[#allocation4 + $0x32c] ss:$16 sps:$4 sm:$0xff]   ;;  %v4514_v44 = vld [vmem:[#allocation4 + $0x344] ss:$16 sps:$4 sm:$0xff]  }
 0x262   :  { %v1264_v62 = vpack.c.bf16 %v1260_v56, %v1256_v54  ;;  %v5112_v63 = vpack.c.bf16 %v1262_v57, %v1258_v55  ;;  %v4517_v45 = vld [vmem:[#allocation4 + $0x34c] ss:$16 sps:$4 sm:$0xff]   ;;  %v4512_v46 = vld [vmem:[#allocation4 + $0x340] ss:$16 sps:$4 sm:$0xff]   ;;  %v4515_v47 = vld [vmem:[#allocation4 + $0x348] ss:$16 sps:$4 sm:$0xff]  }
 0x263   :  { %v1265_v0 = vpack.c.bf16 %v1261_v60, %v1257_v58  ;;  %v1267_v1 = vpack.c.bf16 %v1263_v61, %v1259_v59  ;;  %v4520_v48 = vld [vmem:[#allocation4 + $0x364] ss:$16 sps:$4 sm:$0xff]   ;;  %v4523_v49 = vld [vmem:[#allocation4 + $0x36c] ss:$16 sps:$4 sm:$0xff]   ;;  %v4518_v50 = vld [vmem:[#allocation4 + $0x360] ss:$16 sps:$4 sm:$0xff]  }
 0x264   :  { %v4521_v51 = vld [vmem:[#allocation4 + $0x368] ss:$16 sps:$4 sm:$0xff]   ;;  %v4526_v52 = vld [vmem:[#allocation4 + $0x384] ss:$16 sps:$4 sm:$0xff]   ;;  %v4529_v53 = vld [vmem:[#allocation4 + $0x38c] ss:$16 sps:$4 sm:$0xff]  }
 0x265   :  { %2090 = vmatprep.mubr.bf16.mxu0 %v1265_v0  ;;  %2176 = vmatprep.mubr.bf16.mxu1 %v1265_v0  ;;  %v4524_v54 = vld [vmem:[#allocation4 + $0x380] ss:$16 sps:$4 sm:$0xff]   ;;  %v4527_v55 = vld [vmem:[#allocation4 + $0x388] ss:$16 sps:$4 sm:$0xff]   ;;  %v4532_v56 = vld [vmem:[#allocation4 + $0x3a4] ss:$16 sps:$4 sm:$0xff]  }
 0x266   :  { %2091 = vmatmul.mubr.bf16.vlgmr.msra.gmra.mrb[8].mxu0 %v1264_v62  ;;  %2177 = vmatmul.mubr.bf16.vlgmr.msra.gmra.mrb[8].mxu1 %v1264_v62  ;;  %v4535_v57 = vld [vmem:[#allocation4 + $0x3ac] ss:$16 sps:$4 sm:$0xff]   ;;  %v4530_v58 = vld [vmem:[#allocation4 + $0x3a0] ss:$16 sps:$4 sm:$0xff]   ;;  %v4533_v59 = vld [vmem:[#allocation4 + $0x3a8] ss:$16 sps:$4 sm:$0xff]  }
 0x267   :  { %2102 = vmatpush1.bf16.msra.mxu0 %v4452_v2  ;;  %2188 = vmatpush1.bf16.msra.mxu1 %v4455_v3  ;;  %v4538_v60 = vld [vmem:[#allocation4 + $0x3c4] ss:$16 sps:$4 sm:$0xff]   ;;  %v4541_v61 = vld [vmem:[#allocation4 + $0x3cc] ss:$16 sps:$4 sm:$0xff]   ;;  %v4536_v62 = vld [vmem:[#allocation4 + $0x3c0] ss:$16 sps:$4 sm:$0xff]  }
 0x268   :  { %2133 = vmatprep.mubr.bf16.mxu0 %v1267_v1  ;;  %2219 = vmatprep.mubr.bf16.mxu1 %v1267_v1  ;;  %v4539_v0 = vld [vmem:[#allocation4 + $0x3c8] ss:$16 sps:$4 sm:$0xff]   ;;  %v4544_v1 = vld [vmem:[#allocation4 + $0x3e4] ss:$16 sps:$4 sm:$0xff]   ;;  %v4547_v2 = vld [vmem:[#allocation4 + $0x3ec] ss:$16 sps:$4 sm:$0xff]  }
 0x269   :  { %2103 = vmatprep.subr.bf16.mxu0 %v4460_v4  ;;  %2189 = vmatprep.subr.bf16.mxu1 %v4463_v5  ;;  %v4542_v3 = vld [vmem:[#allocation4 + $0x3e0] ss:$16 sps:$4 sm:$0xff]   ;;  %v4545_v4 = vld [vmem:[#allocation4 + $0x3e8] ss:$16 sps:$4 sm:$0xff]   ;;  %v4550_v5 = vld [vmem:[#allocation6 + $0x4] ss:$16 sps:$4 sm:$0xff]  }
 0x26b   :  { %2104 = vmatpush1.bf16.msra.mxu0 %v4458_v6  ;;  %2190 = vmatpush1.bf16.msra.mxu1 %v4461_v7  ;;  %v4553_v6 = vld [vmem:[#allocation6 + $0xc] ss:$16 sps:$4 sm:$0xff]   ;;  %v4548_v7 = vld [vmem:[#allocation6] ss:$16 sps:$4 sm:$0xff]  }
 0x26c   :  { %2105 = vmatprep.subr.bf16.mxu0 %v4466_v8  ;;  %2191 = vmatprep.subr.bf16.mxu1 %v4469_v9  ;;  %v4551_v8 = vld [vmem:[#allocation6 + $0x8] ss:$16 sps:$4 sm:$0xff]   ;;  %v4556_v9 = vld [vmem:[#allocation6 + $0x24] ss:$16 sps:$4 sm:$0xff]  }
 0x26f   :  { %2106 = vmatpush1.bf16.msra.mxu0 %v4464_v10  ;;  %2192 = vmatpush1.bf16.msra.mxu1 %v4467_v11  ;;  %v4559_v10 = vld [vmem:[#allocation6 + $0x2c] ss:$16 sps:$4 sm:$0xff]   ;;  %v4554_v11 = vld [vmem:[#allocation6 + $0x20] ss:$16 sps:$4 sm:$0xff]  }
 0x270   :  { %2107 = vmatprep.subr.bf16.mxu0 %v4472_v12  ;;  %2193 = vmatprep.subr.bf16.mxu1 %v4475_v13  ;;  %v4557_v12 = vld [vmem:[#allocation6 + $0x28] ss:$16 sps:$4 sm:$0xff]   ;;  %v4562_v13 = vld [vmem:[#allocation6 + $0x44] ss:$16 sps:$4 sm:$0xff]  }
 0x273   :  { %2108 = vmatpush1.bf16.msra.mxu0 %v4470_v14  ;;  %2194 = vmatpush1.bf16.msra.mxu1 %v4473_v15  ;;  %v4565_v14 = vld [vmem:[#allocation6 + $0x4c] ss:$16 sps:$4 sm:$0xff]   ;;  %v4560_v15 = vld [vmem:[#allocation6 + $0x40] ss:$16 sps:$4 sm:$0xff]  }
 0x274   :  { %2109 = vmatprep.subr.bf16.mxu0 %v4478_v17  ;;  %2195 = vmatprep.subr.bf16.mxu1 %v4481_v21  ;;  %v4563_v17 = vld [vmem:[#allocation6 + $0x48] ss:$16 sps:$4 sm:$0xff]   ;;  %v4568_v21 = vld [vmem:[#allocation6 + $0x64] ss:$16 sps:$4 sm:$0xff]  }
 0x277   :  { %2110 = vmatpush1.bf16.msra.mxu0 %v4476_v22  ;;  %2196 = vmatpush1.bf16.msra.mxu1 %v4479_v23  ;;  %v4571_v22 = vld [vmem:[#allocation6 + $0x6c] ss:$16 sps:$4 sm:$0xff]   ;;  %v4566_v23 = vld [vmem:[#allocation6 + $0x60] ss:$16 sps:$4 sm:$0xff]  }
 0x278   :  { %2111 = vmatprep.subr.bf16.mxu0 %v4484_v24  ;;  %2197 = vmatprep.subr.bf16.mxu1 %v4487_v25  ;;  %v4574_v24 = vld [vmem:[#allocation6 + $0x84] ss:$16 sps:$4 sm:$0xff]   ;;  %v4577_v25 = vld [vmem:[#allocation6 + $0x8c] ss:$16 sps:$4 sm:$0xff]  }
 0x27b   :  { %2112 = vmatpush1.bf16.msra.mxu0 %v4482_v27  ;;  %2198 = vmatpush1.bf16.msra.mxu1 %v4485_v28  ;;  %v4572_v27 = vld [vmem:[#allocation6 + $0x80] ss:$16 sps:$4 sm:$0xff]   ;;  %v4575_v28 = vld [vmem:[#allocation6 + $0x88] ss:$16 sps:$4 sm:$0xff]  }
 0x27c   :  { %2113 = vmatprep.subr.bf16.mxu0 %v4490_v29  ;;  %2199 = vmatprep.subr.bf16.mxu1 %v4493_v30  ;;  %v4580_v29 = vld [vmem:[#allocation6 + $0xa4] ss:$16 sps:$4 sm:$0xff]   ;;  %v4583_v30 = vld [vmem:[#allocation6 + $0xac] ss:$16 sps:$4 sm:$0xff]  }
 0x27f   :  { %2114 = vmatpush1.bf16.msra.mxu0 %v4488_v31  ;;  %2200 = vmatpush1.bf16.msra.mxu1 %v4491_v32  ;;  %v4578_v31 = vld [vmem:[#allocation6 + $0xa0] ss:$16 sps:$4 sm:$0xff]   ;;  %v4581_v32 = vld [vmem:[#allocation6 + $0xa8] ss:$16 sps:$4 sm:$0xff]  }
 0x280   :  { %2115 = vmatprep.subr.bf16.mxu0 %v4496_v33  ;;  %2201 = vmatprep.subr.bf16.mxu1 %v4499_v34  ;;  %v4586_v33 = vld [vmem:[#allocation6 + $0xc4] ss:$16 sps:$4 sm:$0xff]   ;;  %v4589_v34 = vld [vmem:[#allocation6 + $0xcc] ss:$16 sps:$4 sm:$0xff]  }
 0x283   :  { %2116 = vmatpush1.bf16.msra.mxu0 %v4494_v35  ;;  %2202 = vmatpush1.bf16.msra.mxu1 %v4497_v36  ;;  %v4584_v35 = vld [vmem:[#allocation6 + $0xc0] ss:$16 sps:$4 sm:$0xff]   ;;  %v4587_v36 = vld [vmem:[#allocation6 + $0xc8] ss:$16 sps:$4 sm:$0xff]  }
 0x284   :  { %2117 = vmatprep.subr.bf16.mxu0 %v4502_v37  ;;  %2203 = vmatprep.subr.bf16.mxu1 %v4505_v38  ;;  %v4592_v37 = vld [vmem:[#allocation6 + $0xe4] ss:$16 sps:$4 sm:$0xff]   ;;  %v4595_v38 = vld [vmem:[#allocation6 + $0xec] ss:$16 sps:$4 sm:$0xff]  }
 0x287   :  { %2118 = vmatpush1.bf16.msra.mxu0 %v4500_v39  ;;  %2204 = vmatpush1.bf16.msra.mxu1 %v4503_v40  ;;  %v4590_v39 = vld [vmem:[#allocation6 + $0xe0] ss:$16 sps:$4 sm:$0xff]   ;;  %v4593_v40 = vld [vmem:[#allocation6 + $0xe8] ss:$16 sps:$4 sm:$0xff]  }
 0x288   :  { %2119 = vmatprep.subr.bf16.mxu0 %v4508_v41  ;;  %2205 = vmatprep.subr.bf16.mxu1 %v4511_v42  ;;  %v4598_v41 = vld [vmem:[#allocation6 + $0x104] ss:$16 sps:$4 sm:$0xff]   ;;  %v4601_v42 = vld [vmem:[#allocation6 + $0x10c] ss:$16 sps:$4 sm:$0xff]  }
 0x28b   :  { %2120 = vmatpush1.bf16.msra.mxu0 %v4506_v26  ;;  %2206 = vmatpush1.bf16.msra.mxu1 %v4509_v43  ;;  %v4596_v26 = vld [vmem:[#allocation6 + $0x100] ss:$16 sps:$4 sm:$0xff]   ;;  %v4599_v43 = vld [vmem:[#allocation6 + $0x108] ss:$16 sps:$4 sm:$0xff]  }
 0x28c   :  { %2121 = vmatprep.subr.bf16.mxu0 %v4514_v44  ;;  %2207 = vmatprep.subr.bf16.mxu1 %v4517_v45  ;;  %v4604_v44 = vld [vmem:[#allocation6 + $0x124] ss:$16 sps:$4 sm:$0xff]   ;;  %v4607_v45 = vld [vmem:[#allocation6 + $0x12c] ss:$16 sps:$4 sm:$0xff]  }
 0x28f   :  { %2122 = vmatpush1.bf16.msra.mxu0 %v4512_v46  ;;  %2208 = vmatpush1.bf16.msra.mxu1 %v4515_v47  ;;  %v4602_v46 = vld [vmem:[#allocation6 + $0x120] ss:$16 sps:$4 sm:$0xff]   ;;  %v4605_v47 = vld [vmem:[#allocation6 + $0x128] ss:$16 sps:$4 sm:$0xff]  }
 0x290   :  { %2123 = vmatprep.subr.bf16.mxu0 %v4520_v48  ;;  %2209 = vmatprep.subr.bf16.mxu1 %v4523_v49  ;;  %v4610_v48 = vld [vmem:[#allocation6 + $0x144] ss:$16 sps:$4 sm:$0xff]   ;;  %v4613_v49 = vld [vmem:[#allocation6 + $0x14c] ss:$16 sps:$4 sm:$0xff]  }
 0x293   :  { %2124 = vmatpush1.bf16.msra.mxu0 %v4518_v50  ;;  %2210 = vmatpush1.bf16.msra.mxu1 %v4521_v51  ;;  %v4608_v50 = vld [vmem:[#allocation6 + $0x140] ss:$16 sps:$4 sm:$0xff]   ;;  %v4611_v51 = vld [vmem:[#allocation6 + $0x148] ss:$16 sps:$4 sm:$0xff]  }
 0x294   :  { %2125 = vmatprep.subr.bf16.mxu0 %v4526_v52  ;;  %2211 = vmatprep.subr.bf16.mxu1 %v4529_v53  ;;  %v4616_v52 = vld [vmem:[#allocation6 + $0x164] ss:$16 sps:$4 sm:$0xff]   ;;  %v4619_v53 = vld [vmem:[#allocation6 + $0x16c] ss:$16 sps:$4 sm:$0xff]  }
 0x297   :  { %2126 = vmatpush1.bf16.msra.mxu0 %v4524_v54  ;;  %2212 = vmatpush1.bf16.msra.mxu1 %v4527_v55  ;;  %v4614_v54 = vld [vmem:[#allocation6 + $0x160] ss:$16 sps:$4 sm:$0xff]   ;;  %v4617_v55 = vld [vmem:[#allocation6 + $0x168] ss:$16 sps:$4 sm:$0xff]  }
 0x298   :  { %2127 = vmatprep.subr.bf16.mxu0 %v4532_v56  ;;  %2213 = vmatprep.subr.bf16.mxu1 %v4535_v57  ;;  %v4622_v56 = vld [vmem:[#allocation6 + $0x184] ss:$16 sps:$4 sm:$0xff]   ;;  %v4625_v57 = vld [vmem:[#allocation6 + $0x18c] ss:$16 sps:$4 sm:$0xff]  }
 0x29b   :  { %2128 = vmatpush1.bf16.msra.mxu0 %v4530_v58  ;;  %2214 = vmatpush1.bf16.msra.mxu1 %v4533_v59  ;;  %v4620_v58 = vld [vmem:[#allocation6 + $0x180] ss:$16 sps:$4 sm:$0xff]   ;;  %v4623_v59 = vld [vmem:[#allocation6 + $0x188] ss:$16 sps:$4 sm:$0xff]  }
 0x29c   :  { %2129 = vmatprep.subr.bf16.mxu0 %v4538_v60  ;;  %2215 = vmatprep.subr.bf16.mxu1 %v4541_v61  ;;  %v4628_v60 = vld [vmem:[#allocation6 + $0x1a4] ss:$16 sps:$4 sm:$0xff]   ;;  %v4631_v61 = vld [vmem:[#allocation6 + $0x1ac] ss:$16 sps:$4 sm:$0xff]  }
 0x29f   :  { %2130 = vmatpush1.bf16.msra.mxu0 %v4536_v62  ;;  %2216 = vmatpush1.bf16.msra.mxu1 %v4539_v0  ;;  %v4626_v62 = vld [vmem:[#allocation6 + $0x1a0] ss:$16 sps:$4 sm:$0xff]   ;;  %v4629_v0 = vld [vmem:[#allocation6 + $0x1a8] ss:$16 sps:$4 sm:$0xff]  }
 0x2a0   :  { %2131 = vmatprep.subr.bf16.mxu0 %v4544_v1  ;;  %2217 = vmatprep.subr.bf16.mxu1 %v4547_v2  ;;  %v4634_v1 = vld [vmem:[#allocation6 + $0x1c4] ss:$16 sps:$4 sm:$0xff]   ;;  %v4637_v2 = vld [vmem:[#allocation6 + $0x1cc] ss:$16 sps:$4 sm:$0xff]  }
 0x2a3   :  { %2132 = vmatpush1.bf16.msra.mxu0 %v4542_v3  ;;  %2218 = vmatpush1.bf16.msra.mxu1 %v4545_v4  ;;  %v4632_v3 = vld [vmem:[#allocation6 + $0x1c0] ss:$16 sps:$4 sm:$0xff]   ;;  %v4635_v4 = vld [vmem:[#allocation6 + $0x1c8] ss:$16 sps:$4 sm:$0xff]  }
 0x2a4   :  { %3080 = vmatprep.subr.bf16.mxu0 %v4550_v5  ;;  %3166 = vmatprep.subr.bf16.mxu1 %v4553_v6  ;;  %v4640_v5 = vld [vmem:[#allocation6 + $0x1e4] ss:$16 sps:$4 sm:$0xff]   ;;  %v4643_v6 = vld [vmem:[#allocation6 + $0x1ec] ss:$16 sps:$4 sm:$0xff]  }
 0x2a6   :  { %2134 = vmatmul.mubr.bf16.vlgmr.msra.gmra.mrb[8].mxu0 %v5112_v63  ;;  %2220 = vmatmul.mubr.bf16.vlgmr.msra.gmra.mrb[8].mxu1 %v5112_v63  ;;  %v4569_v63 = vld [vmem:[#allocation6 + $0x68] ss:$16 sps:$4 sm:$0xff]  }
 0x2a7   :  { %3081 = vmatpush1.bf16.msra.mxu0 %v4548_v7  ;;  %3167 = vmatpush1.bf16.msra.mxu1 %v4551_v8  ;;  %v4638_v7 = vld [vmem:[#allocation6 + $0x1e0] ss:$16 sps:$4 sm:$0xff]   ;;  %v4641_v8 = vld [vmem:[#allocation6 + $0x1e8] ss:$16 sps:$4 sm:$0xff]  }
 0x2a8   :  { %3082 = vmatprep.subr.bf16.mxu0 %v4556_v9  ;;  %3168 = vmatprep.subr.bf16.mxu1 %v4559_v10  ;;  %v4646_v9 = vld [vmem:[#allocation6 + $0x204] ss:$16 sps:$4 sm:$0xff]   ;;  %v4649_v10 = vld [vmem:[#allocation6 + $0x20c] ss:$16 sps:$4 sm:$0xff]  }
 0x2ab   :  { %3083 = vmatpush1.bf16.msra.mxu0 %v4554_v11  ;;  %3169 = vmatpush1.bf16.msra.mxu1 %v4557_v12  ;;  %v1396_v11 = vld [vmem:[%s5153_s6] sm:$0xf] }
 0x2ac   :  { %3084 = vmatprep.subr.bf16.mxu0 %v4562_v13  ;;  %3170 = vmatprep.subr.bf16.mxu1 %v4565_v14  ;;  %v1401_v12 = vrot.slane %v1396_v11, %v5086_v16  ;;  %v1409_v13 = vrot.slane %v1396_v11, %v5093_v19  ;;  %v1405_v14 = vrot.slane %v1396_v11, %v5091_v18 }
 0x2af   :  { %3085 = vmatpush1.bf16.msra.mxu0 %v4560_v15  ;;  %3171 = vmatpush1.bf16.msra.mxu1 %v4563_v17  ;;  %v1413_v15 = vrot.slane %v1396_v11, %v5095_v20 }
 0x2b0   :  { %3086 = vmatprep.subr.bf16.mxu0 %v4568_v21  ;;  %3172 = vmatprep.subr.bf16.mxu1 %v4571_v22 }
 0x2b3   :  { %3087 = vmatpush1.bf16.msra.mxu0 %v4566_v23  ;;  %3173 = vmatpush1.bf16.msra.mxu1 %v4569_v63 }
 0x2b4   :  { %3088 = vmatprep.subr.bf16.mxu0 %v4574_v24  ;;  %3174 = vmatprep.subr.bf16.mxu1 %v4577_v25 }
 0x2b7   :  { %3089 = vmatpush1.bf16.msra.mxu0 %v4572_v27  ;;  %3175 = vmatpush1.bf16.msra.mxu1 %v4575_v28 }
 0x2b8   :  { %3090 = vmatprep.subr.bf16.mxu0 %v4580_v29  ;;  %3176 = vmatprep.subr.bf16.mxu1 %v4583_v30 }
 0x2bb   :  { %3091 = vmatpush1.bf16.msra.mxu0 %v4578_v31  ;;  %3177 = vmatpush1.bf16.msra.mxu1 %v4581_v32 }
 0x2bc   :  { %3092 = vmatprep.subr.bf16.mxu0 %v4586_v33  ;;  %3178 = vmatprep.subr.bf16.mxu1 %v4589_v34 }
 0x2bf   :  { %3093 = vmatpush1.bf16.msra.mxu0 %v4584_v35  ;;  %3179 = vmatpush1.bf16.msra.mxu1 %v4587_v36 }
 0x2c0   :  { %3094 = vmatprep.subr.bf16.mxu0 %v4592_v37  ;;  %3180 = vmatprep.subr.bf16.mxu1 %v4595_v38 }
 0x2c3   :  { %3095 = vmatpush1.bf16.msra.mxu0 %v4590_v39  ;;  %3181 = vmatpush1.bf16.msra.mxu1 %v4593_v40 }
 0x2c4   :  { %3096 = vmatprep.subr.bf16.mxu0 %v4598_v41  ;;  %3182 = vmatprep.subr.bf16.mxu1 %v4601_v42 }
 0x2c7   :  { %3097 = vmatpush1.bf16.msra.mxu0 %v4596_v26  ;;  %3183 = vmatpush1.bf16.msra.mxu1 %v4599_v43 }
 0x2c8   :  { %3098 = vmatprep.subr.bf16.mxu0 %v4604_v44  ;;  %3184 = vmatprep.subr.bf16.mxu1 %v4607_v45 }
 0x2cb   :  { %3099 = vmatpush1.bf16.msra.mxu0 %v4602_v46  ;;  %3185 = vmatpush1.bf16.msra.mxu1 %v4605_v47 }
 0x2cc   :  { %3100 = vmatprep.subr.bf16.mxu0 %v4610_v48  ;;  %3186 = vmatprep.subr.bf16.mxu1 %v4613_v49 }
 0x2cf   :  { %3101 = vmatpush1.bf16.msra.mxu0 %v4608_v50  ;;  %3187 = vmatpush1.bf16.msra.mxu1 %v4611_v51 }
 0x2d0   :  { %3102 = vmatprep.subr.bf16.mxu0 %v4616_v52  ;;  %3188 = vmatprep.subr.bf16.mxu1 %v4619_v53 }
 0x2d3   :  { %3103 = vmatpush1.bf16.msra.mxu0 %v4614_v54  ;;  %3189 = vmatpush1.bf16.msra.mxu1 %v4617_v55 }
 0x2d4   :  { %3104 = vmatprep.subr.bf16.mxu0 %v4622_v56  ;;  %3190 = vmatprep.subr.bf16.mxu1 %v4625_v57 }
 0x2d7   :  { %3105 = vmatpush1.bf16.msra.mxu0 %v4620_v58  ;;  %3191 = vmatpush1.bf16.msra.mxu1 %v4623_v59 }
 0x2d8   :  { %3106 = vmatprep.subr.bf16.mxu0 %v4628_v60  ;;  %3192 = vmatprep.subr.bf16.mxu1 %v4631_v61 }
 0x2db   :  { %3107 = vmatpush1.bf16.msra.mxu0 %v4626_v62  ;;  %3193 = vmatpush1.bf16.msra.mxu1 %v4629_v0 }
 0x2dc   :  { %3108 = vmatprep.subr.bf16.mxu0 %v4634_v1  ;;  %3194 = vmatprep.subr.bf16.mxu1 %v4637_v2 }
 0x2df   :  { %3109 = vmatpush1.bf16.msra.mxu0 %v4632_v3  ;;  %3195 = vmatpush1.bf16.msra.mxu1 %v4635_v4 }
 0x2e0   :  { %3110 = vmatprep.subr.bf16.mxu0 %v4640_v5  ;;  %3196 = vmatprep.subr.bf16.mxu1 %v4643_v6 }
 0x2e3   :  { %3111 = vmatpush1.bf16.msra.mxu0 %v4638_v7  ;;  %3197 = vmatpush1.bf16.msra.mxu1 %v4641_v8 }
 0x2e4   :  { %3123 = vmatprep.subr.bf16.mxu0 %v4646_v9  ;;  %3209 = vmatprep.subr.bf16.mxu1 %v4649_v10 }
 0x379   :  { %v2135_v17 = vpop.f32.mrb[8].mxu0  ;;  %v2221_v21 = vpop.f32.mrb[8].mxu1 }
 0x37a   :  { %v4111_v22 = vadd.f32 %v2135_v17, %v1401_v12  ;;  %v4115_v23 = vadd.f32 %v2221_v21, %v1409_v13  ;;  %v2137_v63 = vpop.f32.mrb[9].mxu0  ;;  %v2223_v24 = vpop.f32.mrb[9].mxu1  ;;  %v4647_v17 = vld [vmem:[#allocation6 + $0x208] ss:$16 sps:$4 sm:$0xff]  }
 0x37b   :  { %v4112_v25 = vadd.f32 %v2137_v63, %v1405_v14  ;;  %v5123_v27 = vadd.f32 %v2223_v24, %v1413_v15  ;;  %v2139_v28 = vpop.f32.mrb[10].mxu0  ;;  %v2225_v29 = vpop.f32.mrb[10].mxu1  ;;  %v4655_v63 = vld [vmem:[#allocation6 + $0x22c] ss:$16 sps:$4 sm:$0xff]   ;;  %v4653_v24 = vld [vmem:[#allocation6 + $0x228] ss:$16 sps:$4 sm:$0xff]  }
 0x37c   :  { %v3890_v30 = vmul.f32 -1.442695, %v4111_v22  ;;  %v3892_v31 = vmul.f32 -1.442695, %v4115_v23  ;;  %v4113_v32 = vadd.f32 %v2139_v28, %v1401_v12  ;;  %v4117_v33 = vadd.f32 %v2225_v29, %v1409_v13  ;;  %v2141_v34 = vpop.f32.mrb[11].mxu0  ;;  %v2227_v35 = vpop.f32.mrb[11].mxu1 }
 0x37d   :  { %v3891_v36 = vmul.f32 -1.442695, %v4112_v25  ;;  %v3893_v37 = vmul.f32 -1.442695, %v5123_v27  ;;  %v4114_v38 = vadd.f32 %v2141_v34, %v1405_v14  ;;  %v4118_v39 = vadd.f32 %v2227_v35, %v1413_v15  ;;  %v4644_v15 = vld [vmem:[#allocation6 + $0x200] ss:$16 sps:$4 sm:$0xff]  }
 0x37e   :  { %4804 = vpow2.f32 %v3890_v30  ;;  %v3894_v40 = vmul.f32 -1.442695, %v4113_v32  ;;  %v3896_v41 = vmul.f32 -1.442695, %v4117_v33  ;;  %v4656_v28 = vld [vmem:[#allocation6 + $0x240] ss:$16 sps:$4 sm:$0xff]  }
 0x37f   :  { %4806 = vpow2.f32 %v3892_v31  ;;  %v3895_v42 = vmul.f32 -1.442695, %v4114_v38  ;;  %v3897_v26 = vmul.f32 -1.442695, %v4118_v39  ;;  %v4659_v29 = vld [vmem:[#allocation6 + $0x248] ss:$16 sps:$4 sm:$0xff]  }
 0x380   :  { %4808 = vpow2.f32 %v3891_v36  ;;  %v4664_v30 = vld [vmem:[#allocation6 + $0x264] ss:$16 sps:$4 sm:$0xff]   ;;  %v4667_v31 = vld [vmem:[#allocation6 + $0x26c] ss:$16 sps:$4 sm:$0xff]   ;;  %v4668_v36 = vld [vmem:[#allocation6 + $0x280] ss:$16 sps:$4 sm:$0xff]  }
 0x381   :  { %4810 = vpow2.f32 %v3893_v37  ;;  %v4670_v34 = vld [vmem:[#allocation6 + $0x284] ss:$16 sps:$4 sm:$0xff]   ;;  %v4673_v35 = vld [vmem:[#allocation6 + $0x28c] ss:$16 sps:$4 sm:$0xff]   ;;  %v4671_v37 = vld [vmem:[#allocation6 + $0x288] ss:$16 sps:$4 sm:$0xff]  }
 0x382   :  { %4812 = vpow2.f32 %v3894_v40  ;;  %v4674_v40 = vld [vmem:[#allocation6 + $0x2a0] ss:$16 sps:$4 sm:$0xff]  }
 0x383   :  { %4814 = vpow2.f32 %v3896_v41  ;;  %v4677_v41 = vld [vmem:[#allocation6 + $0x2a8] ss:$16 sps:$4 sm:$0xff]  }
 0x384   :  { %4816 = vpow2.f32 %v3895_v42  ;;  %v4682_v42 = vld [vmem:[#allocation6 + $0x2c4] ss:$16 sps:$4 sm:$0xff]  }
 0x385   :  { %4818 = vpow2.f32 %v3897_v26  ;;  %v4685_v26 = vld [vmem:[#allocation6 + $0x2cc] ss:$16 sps:$4 sm:$0xff]  }
 0x388   :  { %v4805_v43 = vpop.eup %4804 }
 0x389   :  { %v4807_v44 = vpop.eup %4806  ;;  %v2254_v45 = vadd.f32 1.0, %v4805_v43  ;;  %v4680_v43 = vld [vmem:[#allocation6 + $0x2c0] ss:$16 sps:$4 sm:$0xff]  }
 0x38a   :  { %v4809_v46 = vpop.eup %4808  ;;  %v2256_v47 = vadd.f32 1.0, %v4807_v44  ;;  %v4683_v44 = vld [vmem:[#allocation6 + $0x2c8] ss:$16 sps:$4 sm:$0xff]  }
 0x38b   :  { %v4811_v48 = vpop.eup %4810  ;;  %4820 = vrcp.f32 %v2254_v45  ;;  %v2255_v49 = vadd.f32 1.0, %v4809_v46  ;;  %v4688_v45 = vld [vmem:[#allocation6 + $0x2e4] ss:$16 sps:$4 sm:$0xff]   ;;  %v4691_v46 = vld [vmem:[#allocation6 + $0x2ec] ss:$16 sps:$4 sm:$0xff]  }
 0x38c   :  { %v4813_v50 = vpop.eup %4812  ;;  %4822 = vrcp.f32 %v2256_v47  ;;  %v2257_v51 = vadd.f32 1.0, %v4811_v48  ;;  %v4686_v47 = vld [vmem:[#allocation6 + $0x2e0] ss:$16 sps:$4 sm:$0xff]   ;;  %v4689_v48 = vld [vmem:[#allocation6 + $0x2e8] ss:$16 sps:$4 sm:$0xff]  }
 0x38d   :  { %v4815_v52 = vpop.eup %4814  ;;  %4824 = vrcp.f32 %v2255_v49  ;;  %v2258_v53 = vadd.f32 1.0, %v4813_v50  ;;  %v4694_v49 = vld [vmem:[#allocation6 + $0x304] ss:$16 sps:$4 sm:$0xff]   ;;  %v4697_v50 = vld [vmem:[#allocation6 + $0x30c] ss:$16 sps:$4 sm:$0xff]  }
 0x38e   :  { %v4817_v54 = vpop.eup %4816  ;;  %4826 = vrcp.f32 %v2257_v51  ;;  %v2260_v55 = vadd.f32 1.0, %v4815_v52  ;;  %v4692_v51 = vld [vmem:[#allocation6 + $0x300] ss:$16 sps:$4 sm:$0xff]   ;;  %v4695_v52 = vld [vmem:[#allocation6 + $0x308] ss:$16 sps:$4 sm:$0xff]  }
 0x38f   :  { %v4819_v56 = vpop.eup %4818  ;;  %4828 = vrcp.f32 %v2258_v53  ;;  %v2259_v57 = vadd.f32 1.0, %v4817_v54  ;;  %v4700_v53 = vld [vmem:[#allocation6 + $0x324] ss:$16 sps:$4 sm:$0xff]   ;;  %v4703_v54 = vld [vmem:[#allocation6 + $0x32c] ss:$16 sps:$4 sm:$0xff]  }
 0x390   :  { %4830 = vrcp.f32 %v2260_v55  ;;  %v2261_v58 = vadd.f32 1.0, %v4819_v56  ;;  %v4698_v55 = vld [vmem:[#allocation6 + $0x320] ss:$16 sps:$4 sm:$0xff]   ;;  %v4701_v56 = vld [vmem:[#allocation6 + $0x328] ss:$16 sps:$4 sm:$0xff]  }
 0x391   :  { %4832 = vrcp.f32 %v2259_v57  ;;  %v4706_v57 = vld [vmem:[#allocation6 + $0x344] ss:$16 sps:$4 sm:$0xff]  }
 0x392   :  { %4834 = vrcp.f32 %v2261_v58  ;;  %v4709_v58 = vld [vmem:[#allocation6 + $0x34c] ss:$16 sps:$4 sm:$0xff]  }
 0x395   :  { %v4821_v59 = vpop.eup %4820 }
 0x396   :  { %v4823_v60 = vpop.eup %4822  ;;  %v2278_v2 = vmul.f32 %v4821_v59, %v4111_v22  ;;  %v4652_v22 = vld [vmem:[#allocation6 + $0x224] ss:$16 sps:$4 sm:$0xff]   ;;  %v4704_v59 = vld [vmem:[#allocation6 + $0x340] ss:$16 sps:$4 sm:$0xff]  }
 0x397   :  { %v4825_v61 = vpop.eup %4824  ;;  %v2280_v5 = vmul.f32 %v4823_v60, %v4115_v23  ;;  %v4650_v23 = vld [vmem:[#allocation6 + $0x220] ss:$16 sps:$4 sm:$0xff]   ;;  %v4707_v60 = vld [vmem:[#allocation6 + $0x348] ss:$16 sps:$4 sm:$0xff]  }
 0x398   :  { %v4827_v62 = vpop.eup %4826  ;;  %v2279_v8 = vmul.f32 %v4825_v61, %v4112_v25  ;;  %v4658_v25 = vld [vmem:[#allocation6 + $0x244] ss:$16 sps:$4 sm:$0xff]  }
 0x399   :  { %v4829_v0 = vpop.eup %4828  ;;  %v2281_v11 = vmul.f32 %v4827_v62, %v5123_v27  ;;  %v4661_v27 = vld [vmem:[#allocation6 + $0x24c] ss:$16 sps:$4 sm:$0xff]   ;;  %v4712_v61 = vld [vmem:[#allocation6 + $0x364] ss:$16 sps:$4 sm:$0xff]  }
 0x39a   :  { %v4831_v1 = vpop.eup %4830  ;;  %v2282_v3 = vmul.f32 %v4829_v0, %v4113_v32  ;;  %v4662_v32 = vld [vmem:[#allocation6 + $0x260] ss:$16 sps:$4 sm:$0xff]   ;;  %v4715_v62 = vld [vmem:[#allocation6 + $0x36c] ss:$16 sps:$4 sm:$0xff]  }
 0x39b   :  { %v4833_v4 = vpop.eup %4832  ;;  %v2284_v6 = vmul.f32 %v4831_v1, %v4117_v33  ;;  %v4665_v33 = vld [vmem:[#allocation6 + $0x268] ss:$16 sps:$4 sm:$0xff]   ;;  %v4710_v0 = vld [vmem:[#allocation6 + $0x360] ss:$16 sps:$4 sm:$0xff]  }
 0x39c   :  { %v4835_v7 = vpop.eup %4834  ;;  %v2286_v9 = vpack.c.bf16 %v2282_v3, %v2278_v2  ;;  %v2283_v10 = vmul.f32 %v4833_v4, %v4114_v38  ;;  %v4676_v38 = vld [vmem:[#allocation6 + $0x2a4] ss:$16 sps:$4 sm:$0xff]   ;;  %v4713_v1 = vld [vmem:[#allocation6 + $0x368] ss:$16 sps:$4 sm:$0xff]   ;;  %v4721_v3 = vld [vmem:[#allocation6 + $0x38c] ss:$16 sps:$4 sm:$0xff]  }
 0x39d   :  { %v5127_v12 = vpack.c.bf16 %v2284_v6, %v2280_v5  ;;  %v2285_v13 = vmul.f32 %v4835_v7, %v4118_v39  ;;  %v4679_v39 = vld [vmem:[#allocation6 + $0x2ac] ss:$16 sps:$4 sm:$0xff]   ;;  %v4718_v2 = vld [vmem:[#allocation6 + $0x384] ss:$16 sps:$4 sm:$0xff]   ;;  %v4716_v4 = vld [vmem:[#allocation6 + $0x380] ss:$16 sps:$4 sm:$0xff]  }
 0x39e   :  { %v2287_v14 = vpack.c.bf16 %v2283_v10, %v2279_v8  ;;  %v4719_v5 = vld [vmem:[#allocation6 + $0x388] ss:$16 sps:$4 sm:$0xff]   ;;  %v4724_v6 = vld [vmem:[#allocation6 + $0x3a4] ss:$16 sps:$4 sm:$0xff]   ;;  %v4727_v7 = vld [vmem:[#allocation6 + $0x3ac] ss:$16 sps:$4 sm:$0xff]  }
 0x39f   :  { %v2289_v21 = vpack.c.bf16 %v2285_v13, %v2281_v11  ;;  %v4722_v8 = vld [vmem:[#allocation6 + $0x3a0] ss:$16 sps:$4 sm:$0xff]   ;;  %v4730_v10 = vld [vmem:[#allocation6 + $0x3c4] ss:$16 sps:$4 sm:$0xff]   ;;  %v4733_v11 = vld [vmem:[#allocation6 + $0x3cc] ss:$16 sps:$4 sm:$0xff]  }
 0x3a0   :  { %3112 = vmatprep.mubr.bf16.mxu0 %v2287_v14  ;;  %3198 = vmatprep.mubr.bf16.mxu1 %v2287_v14  ;;  %v4728_v13 = vld [vmem:[#allocation6 + $0x3c0] ss:$16 sps:$4 sm:$0xff]   ;;  %v4731_v14 = vld [vmem:[#allocation6 + $0x3c8] ss:$16 sps:$4 sm:$0xff]  }
 0x3a1   :  { %3113 = vmatmul.mubr.bf16.vlgmr.msra.gmra.mrb[12].mxu0 %v2286_v9  ;;  %3199 = vmatmul.mubr.bf16.vlgmr.msra.gmra.mrb[12].mxu1 %v2286_v9  ;;  %v4725_v9 = vld [vmem:[#allocation6 + $0x3a8] ss:$16 sps:$4 sm:$0xff]  }
 0x3a2   :  { %3124 = vmatpush1.bf16.msra.mxu0 %v4644_v15  ;;  %3210 = vmatpush1.bf16.msra.mxu1 %v4647_v17  ;;  %v4736_v15 = vld [vmem:[#allocation6 + $0x3e4] ss:$16 sps:$4 sm:$0xff]   ;;  %v4739_v17 = vld [vmem:[#allocation6 + $0x3ec] ss:$16 sps:$4 sm:$0xff]  }
 0x3a3   :  { %3155 = vmatprep.mubr.bf16.mxu0 %v2289_v21  ;;  %3241 = vmatprep.mubr.bf16.mxu1 %v2289_v21  ;;  %v4734_v21 = vld [vmem:[#allocation6 + $0x3e0] ss:$16 sps:$4 sm:$0xff]  }
 0x3a4   :  { %3125 = vmatprep.subr.bf16.mxu0 %v4652_v22  ;;  %3211 = vmatprep.subr.bf16.mxu1 %v4655_v63  ;;  %v4737_v22 = vld [vmem:[#allocation6 + $0x3e8] ss:$16 sps:$4 sm:$0xff]   ;;  %v4740_v63 = vld [vmem:[#allocation7 + $0x40] sm:$0xff]  }
 0x3a6   :  { %3126 = vmatpush1.bf16.msra.mxu0 %v4650_v23  ;;  %3212 = vmatpush1.bf16.msra.mxu1 %v4653_v24  ;;  %v4741_v23 = vld [vmem:[#allocation7 + $0xc0] sm:$0xff]  }
 0x3a7   :  { %3127 = vmatprep.subr.bf16.mxu0 %v4658_v25  ;;  %3213 = vmatprep.subr.bf16.mxu1 %v4661_v27  ;;  %v4742_v24 = vld [vmem:[#allocation7] sm:$0xff]   ;;  %v4744_v27 = vld [vmem:[#allocation7 + $0x48] sm:$0xff]  }
 0x3a8   :  { %v4743_v25 = vld [vmem:[#allocation7 + $0x80] sm:$0xff]  }
 0x3aa   :  { %3128 = vmatpush1.bf16.msra.mxu0 %v4656_v28  ;;  %3214 = vmatpush1.bf16.msra.mxu1 %v4659_v29  ;;  %v4745_v28 = vld [vmem:[#allocation7 + $0xc8] sm:$0xff]  }
 0x3ab   :  { %3129 = vmatprep.subr.bf16.mxu0 %v4664_v30  ;;  %3215 = vmatprep.subr.bf16.mxu1 %v4667_v31  ;;  %v4746_v29 = vld [vmem:[#allocation7 + $0x8] sm:$0xff]   ;;  %v4748_v31 = vld [vmem:[#allocation7 + $0x50] sm:$0xff]  }
 0x3ac   :  { %v4747_v30 = vld [vmem:[#allocation7 + $0x88] sm:$0xff]  }
 0x3ae   :  { %3130 = vmatpush1.bf16.msra.mxu0 %v4662_v32  ;;  %3216 = vmatpush1.bf16.msra.mxu1 %v4665_v33  ;;  %v4749_v32 = vld [vmem:[#allocation7 + $0xd0] sm:$0xff]  }
 0x3af   :  { %3131 = vmatprep.subr.bf16.mxu0 %v4670_v34  ;;  %3217 = vmatprep.subr.bf16.mxu1 %v4673_v35  ;;  %v4750_v33 = vld [vmem:[#allocation7 + $0x10] sm:$0xff]   ;;  %v4752_v35 = vld [vmem:[#allocation7 + $0x58] sm:$0xff]  }
 0x3b0   :  { %v4751_v34 = vld [vmem:[#allocation7 + $0x90] sm:$0xff]  }
 0x3b2   :  { %3132 = vmatpush1.bf16.msra.mxu0 %v4668_v36  ;;  %3218 = vmatpush1.bf16.msra.mxu1 %v4671_v37  ;;  %v4753_v36 = vld [vmem:[#allocation7 + $0xd8] sm:$0xff]  }
 0x3b3   :  { %3133 = vmatprep.subr.bf16.mxu0 %v4676_v38  ;;  %3219 = vmatprep.subr.bf16.mxu1 %v4679_v39  ;;  %v4754_v37 = vld [vmem:[#allocation7 + $0x18] sm:$0xff]   ;;  %v4756_v38 = vld [vmem:[#allocation7 + $0x60] sm:$0xff]  }
 0x3b4   :  { %v4757_v39 = vld [vmem:[#allocation7 + $0xe0] sm:$0xff]  }
 0x3b6   :  { %3134 = vmatpush1.bf16.msra.mxu0 %v4674_v40  ;;  %3220 = vmatpush1.bf16.msra.mxu1 %v4677_v41  ;;  %v4758_v40 = vld [vmem:[#allocation7 + $0x20] sm:$0xff]  }
 0x3b7   :  { %3135 = vmatprep.subr.bf16.mxu0 %v4682_v42  ;;  %3221 = vmatprep.subr.bf16.mxu1 %v4685_v26  ;;  %v4759_v41 = vld [vmem:[#allocation7 + $0xa0] sm:$0xff]   ;;  %v4760_v42 = vld [vmem:[#allocation7 + $0x68] sm:$0xff]  }
 0x3b8   :  { %v4761_v26 = vld [vmem:[#allocation7 + $0xe8] sm:$0xff]  }
 0x3ba   :  { %3136 = vmatpush1.bf16.msra.mxu0 %v4680_v43  ;;  %3222 = vmatpush1.bf16.msra.mxu1 %v4683_v44  ;;  %v4762_v43 = vld [vmem:[#allocation7 + $0x28] sm:$0xff]  }
 0x3bb   :  { %3137 = vmatprep.subr.bf16.mxu0 %v4688_v45  ;;  %3223 = vmatprep.subr.bf16.mxu1 %v4691_v46  ;;  %v4763_v44 = vld [vmem:[#allocation7 + $0xa8] sm:$0xff]   ;;  %v4764_v45 = vld [vmem:[#allocation7 + $0x70] sm:$0xff]  }
 0x3bc   :  { %v4765_v46 = vld [vmem:[#allocation7 + $0xf0] sm:$0xff]  }
 0x3be   :  { %3138 = vmatpush1.bf16.msra.mxu0 %v4686_v47  ;;  %3224 = vmatpush1.bf16.msra.mxu1 %v4689_v48  ;;  %v4766_v47 = vld [vmem:[#allocation7 + $0x30] sm:$0xff]  }
 0x3bf   :  { %3139 = vmatprep.subr.bf16.mxu0 %v4694_v49  ;;  %3225 = vmatprep.subr.bf16.mxu1 %v4697_v50  ;;  %v4767_v48 = vld [vmem:[#allocation7 + $0xb0] sm:$0xff]   ;;  %v4768_v49 = vld [vmem:[#allocation7 + $0x78] sm:$0xff]  }
 0x3c0   :  { %v4769_v50 = vld [vmem:[#allocation7 + $0xf8] sm:$0xff]  }
 0x3c2   :  { %3140 = vmatpush1.bf16.msra.mxu0 %v4692_v51  ;;  %3226 = vmatpush1.bf16.msra.mxu1 %v4695_v52  ;;  %v4770_v51 = vld [vmem:[#allocation7 + $0x38] sm:$0xff]  }
 0x3c3   :  { %3141 = vmatprep.subr.bf16.mxu0 %v4700_v53  ;;  %3227 = vmatprep.subr.bf16.mxu1 %v4703_v54  ;;  %v4771_v52 = vld [vmem:[#allocation7 + $0xb8] sm:$0xff]   ;;  %v2418_v53 = vld [vmem:[%s5155_s8] sm:$0xf] }
 0x3c4   :  { %v2423_v54 = vrot.slane %v2418_v53, %v5086_v16 }
 0x3c6   :  { %3142 = vmatpush1.bf16.msra.mxu0 %v4698_v55  ;;  %3228 = vmatpush1.bf16.msra.mxu1 %v4701_v56  ;;  %v2431_v55 = vrot.slane %v2418_v53, %v5093_v19  ;;  %v2427_v56 = vrot.slane %v2418_v53, %v5091_v18 }
 0x3c7   :  { %3143 = vmatprep.subr.bf16.mxu0 %v4706_v57  ;;  %3229 = vmatprep.subr.bf16.mxu1 %v4709_v58  ;;  %v2435_v57 = vrot.slane %v2418_v53, %v5095_v20 }
 0x3ca   :  { %3144 = vmatpush1.bf16.msra.mxu0 %v4704_v59  ;;  %3230 = vmatpush1.bf16.msra.mxu1 %v4707_v60 }
 0x3cb   :  { %3145 = vmatprep.subr.bf16.mxu0 %v4712_v61  ;;  %3231 = vmatprep.subr.bf16.mxu1 %v4715_v62 }
 0x3ce   :  { %3146 = vmatpush1.bf16.msra.mxu0 %v4710_v0  ;;  %3232 = vmatpush1.bf16.msra.mxu1 %v4713_v1 }
 0x3cf   :  { %3147 = vmatprep.subr.bf16.mxu0 %v4718_v2  ;;  %3233 = vmatprep.subr.bf16.mxu1 %v4721_v3 }
 0x3d2   :  { %3148 = vmatpush1.bf16.msra.mxu0 %v4716_v4  ;;  %3234 = vmatpush1.bf16.msra.mxu1 %v4719_v5 }
 0x3d3   :  { %3149 = vmatprep.subr.bf16.mxu0 %v4724_v6  ;;  %3235 = vmatprep.subr.bf16.mxu1 %v4727_v7 }
 0x3d6   :  { %3150 = vmatpush1.bf16.msra.mxu0 %v4722_v8  ;;  %3236 = vmatpush1.bf16.msra.mxu1 %v4725_v9 }
 0x3d7   :  { %3151 = vmatprep.subr.bf16.mxu0 %v4730_v10  ;;  %3237 = vmatprep.subr.bf16.mxu1 %v4733_v11 }
 0x3da   :  { %3152 = vmatpush1.bf16.msra.mxu0 %v4728_v13  ;;  %3238 = vmatpush1.bf16.msra.mxu1 %v4731_v14 }
 0x3db   :  { %3153 = vmatprep.subr.bf16.mxu0 %v4736_v15  ;;  %3239 = vmatprep.subr.bf16.mxu1 %v4739_v17 }
 0x3de   :  { %3154 = vmatpush1.bf16.msra.mxu0 %v4734_v21  ;;  %3240 = vmatpush1.bf16.msra.mxu1 %v4737_v22 }
 0x3df   :  { %4059 = vmatprep.subr.bf16.mxu0 %v4740_v63  ;;  %4081 = vmatprep.subr.bf16.mxu1 %v4741_v23 }
 0x3e1   :  { %3156 = vmatmul.mubr.bf16.vlgmr.msra.gmra.mrb[12].mxu0 %v5127_v12  ;;  %3242 = vmatmul.mubr.bf16.vlgmr.msra.gmra.mrb[12].mxu1 %v5127_v12  ;;  %v4755_v12 = vld [vmem:[#allocation7 + $0x98] sm:$0xff]  }
 0x3e2   :  { %4060 = vmatpush3.bf16.msra.mxu0 %v4742_v24  ;;  %4082 = vmatpush3.bf16.msra.mxu1 %v4743_v25  ;;  %v4026_v25 = vld [vmem:[%s5157_s10] ss:$0 sm:$0xff] }
 0x3e3   :  { %4061 = vmatprep.subr.bf16.mxu0 %v4744_v27  ;;  %4083 = vmatprep.subr.bf16.mxu1 %v4745_v28 }
 0x3e6   :  { %4062 = vmatpush3.bf16.msra.mxu0 %v4746_v29  ;;  %4084 = vmatpush3.bf16.msra.mxu1 %v4747_v30 }
 0x3e7   :  { %4063 = vmatprep.subr.bf16.mxu0 %v4748_v31  ;;  %4085 = vmatprep.subr.bf16.mxu1 %v4749_v32 }
 0x3ea   :  { %4064 = vmatpush3.bf16.msra.mxu0 %v4750_v33  ;;  %4086 = vmatpush3.bf16.msra.mxu1 %v4751_v34 }
 0x3eb   :  { %4065 = vmatprep.subr.bf16.mxu0 %v4752_v35  ;;  %4087 = vmatprep.subr.bf16.mxu1 %v4753_v36 }
 0x3ee   :  { %4066 = vmatpush3.bf16.msra.mxu0 %v4754_v37  ;;  %4088 = vmatpush3.bf16.msra.mxu1 %v4755_v12 }
 0x3ef   :  { %4067 = vmatprep.subr.bf16.mxu0 %v4756_v38  ;;  %4089 = vmatprep.subr.bf16.mxu1 %v4757_v39 }
 0x3f2   :  { %4068 = vmatpush3.bf16.msra.mxu0 %v4758_v40  ;;  %4090 = vmatpush3.bf16.msra.mxu1 %v4759_v41 }
 0x3f3   :  { %4069 = vmatprep.subr.bf16.mxu0 %v4760_v42  ;;  %4091 = vmatprep.subr.bf16.mxu1 %v4761_v26 }
 0x3f6   :  { %4070 = vmatpush3.bf16.msra.mxu0 %v4762_v43  ;;  %4092 = vmatpush3.bf16.msra.mxu1 %v4763_v44 }
 0x3f7   :  { %4071 = vmatprep.subr.bf16.mxu0 %v4764_v45  ;;  %4093 = vmatprep.subr.bf16.mxu1 %v4765_v46 }
 0x3fa   :  { %4072 = vmatpush3.bf16.msra.mxu0 %v4766_v47  ;;  %4094 = vmatpush3.bf16.msra.mxu1 %v4767_v48 }
 0x3fb   :  { %4073 = vmatprep.subr.bf16.mxu0 %v4768_v49  ;;  %4095 = vmatprep.subr.bf16.mxu1 %v4769_v50 }
 0x3fe   :  { %4074 = vmatpush3.bf16.msra.mxu0 %v4770_v51  ;;  %4096 = vmatpush3.bf16.msra.mxu1 %v4771_v52 }
 0x4b4   :  { %v3157_v58 = vpop.f32.mrb[12].mxu0  ;;  %v3243_v59 = vpop.f32.mrb[12].mxu1 }
 0x4b5   :  { %v4119_v60 = vadd.f32 %v3157_v58, %v2423_v54  ;;  %v4123_v61 = vadd.f32 %v3243_v59, %v2431_v55  ;;  %v3159_v62 = vpop.f32.mrb[13].mxu0  ;;  %v3245_v0 = vpop.f32.mrb[13].mxu1 }
 0x4b6   :  { %v4120_v1 = vadd.f32 %v3159_v62, %v2427_v56  ;;  %v4124_v2 = vadd.f32 %v3245_v0, %v2435_v57  ;;  %v3161_v3 = vpop.f32.mrb[14].mxu0  ;;  %v3247_v4 = vpop.f32.mrb[14].mxu1 }
 0x4b7   :  { %v4121_v5 = vadd.f32 %v3161_v3, %v2423_v54  ;;  %v4125_v6 = vadd.f32 %v3247_v4, %v2431_v55  ;;  %v3163_v7 = vpop.f32.mrb[15].mxu0  ;;  %v3249_v16 = vpop.f32.mrb[15].mxu1  ;;  %v3252_v9 = vmax.f32 %v4119_v60, 0.0  ;;  %v3254_v18 = vmax.f32 %v4123_v61, 0.0 }
 0x4b8   :  { %v4122_v8 = vadd.f32 %v3163_v7, %v2427_v56  ;;  %v4126_v19 = vadd.f32 %v3249_v16, %v2435_v57  ;;  %v3253_v11 = vmax.f32 %v4120_v1, 0.0  ;;  %v3255_v13 = vmax.f32 %v4124_v2, 0.0 }
 0x4b9   :  { %v3256_v10 = vmax.f32 %v4121_v5, 0.0  ;;  %v3258_v20 = vmax.f32 %v4125_v6, 0.0 }
 0x4ba   :  { %v3257_v14 = vmax.f32 %v4122_v8, 0.0  ;;  %v3259_v15 = vmax.f32 %v4126_v19, 0.0 }
 0x4bb   :  { %v3260_v17 = vpack.c.bf16 %v3256_v10, %v3252_v9  ;;  %v3262_v21 = vpack.c.bf16 %v3258_v20, %v3254_v18 }
 0x4bc   :  { %v3261_v22 = vpack.c.bf16 %v3257_v14, %v3253_v11  ;;  %v3263_v63 = vpack.c.bf16 %v3259_v15, %v3255_v13 }
 0x4be   :  { %3559 = vmatprep.mubr.bf16.mxu0 %v3261_v22  ;;  %3600 = vmatprep.mubr.bf16.mxu1 %v3263_v63 }
 0x4bf   :  { %3560 = vmatmul.mubr.bf16.vlgmr.msra.gmra.mrb[16].mxu0 %v3260_v17  ;;  %3601 = vmatmul.mubr.bf16.vlgmr.msra.gmra.mrb[16].mxu1 %v3262_v21 }
 0x592   :  { %v4075_v23 = vpop.f32.mrb[16].mxu0  ;;  %v4097_v24 = vpop.f32.mrb[16].mxu1 }
 0x593   :  { %v4076_v27 = vpop.f32.mrb[17].mxu0  ;;  %v4098_v28 = vpop.f32.mrb[17].mxu1 }
 0x594   :  { %v4077_v29 = vadd.f32 %v4076_v27, %v4075_v23  ;;  %v4099_v30 = vadd.f32 %v4098_v28, %v4097_v24  ;;  %v4078_v31 = vpop.f32.mrb[18].mxu0  ;;  %v4100_v32 = vpop.f32.mrb[18].mxu1 }
 0x595   :  { %v4079_v33 = vpop.f32.mrb[19].mxu0  ;;  %v4101_v34 = vpop.f32.mrb[19].mxu1 }
 0x596   :  { %v3562_v35 = vadd.f32 %v4077_v29, %v4026_v25  ;;  %v4080_v36 = vadd.f32 %v4079_v33, %v4078_v31  ;;  %v4102_v37 = vadd.f32 %v4101_v34, %v4100_v32 }
 0x598   :  { %v3603_v12 = vadd.f32 %v4099_v30, %v3562_v35  ;;  %v3565_v38 = vadd.f32 %v4080_v36, %v4026_v25 }
 0x59a   :  { %3609 = vst [vmem:[%s5158_s11] sm:$0xff] %v3603_v12  ;;  %v3606_v39 = vadd.f32 %v4102_v37, %v3565_v38 }
 0x59c   :  { %3610 = vst [vmem:[%s5158_s11 + $0x8] sm:$0xff] %v3606_v39 }
 0x59d   :  { %3615 = vsyncpa [#allocation3], 1 }
 0x59e   :  { %3616 = vsyncpa [#allocation5], 1 }
 0x59f   :  { %3617 = vsyncpa [#allocation8], 1 }

</bundles_post_ra>
